<compile_context>
chip_gen: v7x
topology: tpu7x:2x2x1
jax: 0.10.0
libtpu: 0.0.40
codegen_flags: <defaults>
</compile_context>

<pallas_src>
import math
import jax
import jax.numpy as jnp
from jax.experimental import pallas as pl
from jax.experimental.pallas import tpu as pltpu

# ---- small, module-consistent hyperparameters ----
D_MODEL   = 128
NUM_HEADS = 4
HEAD_DIM  = D_MODEL // NUM_HEADS
D_FF      = 256
SEQ       = 8
BATCH     = 2
LN_EPS    = 1e-5


# =====================  fused Pallas kernel  =====================

def _layer_norm(y, g, b):
    mu = jnp.mean(y, axis=-1, keepdims=True)
    var = jnp.mean((y - mu) ** 2, axis=-1, keepdims=True)
    return (y - mu) * jax.lax.rsqrt(var + LN_EPS) * g + b


def encoder_layer_kernel(x_ref, wqkv_ref, bqkv_ref, wo_ref, bo_ref,
                         ln1_g_ref, ln1_b_ref,
                         w1_ref, b1_ref, w2_ref, b2_ref,
                         ln2_g_ref, ln2_b_ref,
                         out_ref, attn_ref):
    x = x_ref[0]                                   # (S, D)
    S, D = x.shape
    H = attn_ref.shape[1]
    HD = D // H
    scale = 1.0 / math.sqrt(HD)

    # ---- fused QKV projection: one (S,D)@(D,3D) MXU op ----
    qkv = jnp.dot(x, wqkv_ref[...], preferred_element_type=jnp.float32) + bqkv_ref[...]
    q = qkv[:, 0:D] * scale                        # fold softmax scale into q once
    k = qkv[:, D:2 * D]
    v = qkv[:, 2 * D:3 * D]

    # ---- per-head attention (static unroll; S, HD are tiny) ----
    ctx_heads = []
    attn_heads = []
    for h in range(H):
        sl = slice(h * HD, (h + 1) * HD)
        scores = jnp.dot(q[:, sl], k[:, sl].T, preferred_element_type=jnp.float32)
        scores = scores - jnp.max(scores, axis=-1, keepdims=True)
        e = jnp.exp(scores)
        attn = e / jnp.sum(e, axis=-1, keepdims=True)          # (S, S)
        attn_heads.append(attn)
        ctx_heads.append(jnp.dot(attn, v[:, sl],
                                 preferred_element_type=jnp.float32))  # (S, HD)

    attn_ref[0] = jnp.stack(attn_heads, axis=0)    # single (H,S,S) store per batch
    ctx = jnp.concatenate(ctx_heads, axis=-1)      # (S, D)

    # ---- single output projection (hoisted out of the head loop) ----
    att_out = jnp.dot(ctx, wo_ref[...], preferred_element_type=jnp.float32) + bo_ref[...]

    # ---- residual + LayerNorm1 (dropout = identity in eval) ----
    x1 = x + _layer_norm(att_out, ln1_g_ref[...], ln1_b_ref[...])

    # ---- feed forward: relu(x1 @ w1 + b1) @ w2 + b2 ----
    hdn = jnp.dot(x1, w1_ref[...], preferred_element_type=jnp.float32) + b1_ref[...]
    hdn = jnp.maximum(hdn, 0.0)
    ff = jnp.dot(hdn, w2_ref[...], preferred_element_type=jnp.float32) + b2_ref[...]

    # ---- residual + LayerNorm2 ----
    out_ref[0] = x1 + _layer_norm(ff, ln2_g_ref[...], ln2_b_ref[...])


# =====================  wrapper  =====================

def encoder_layer_pallas(x, p):
    B, S, D = x.shape
    H = NUM_HEADS
    wqkv = jnp.concatenate([p["wq"], p["wk"], p["wv"]], axis=1)   # (D, 3D)
    bqkv = jnp.concatenate([p["bq"], p["bk"], p["bv"]], axis=1)   # (1, 3D)

    out, attn = pl.pallas_call(
        encoder_layer_kernel,
        out_shape=(jax.ShapeDtypeStruct((B, S, D), jnp.float32),
                   jax.ShapeDtypeStruct((B, H, S, S), jnp.float32)),
        grid=(B,),
        in_specs=[
            pl.BlockSpec((1, S, D), lambda b: (b, 0, 0)),     # x (per-batch block)
            pl.BlockSpec((D, 3 * D), lambda b: (0, 0)),       # wqkv
            pl.BlockSpec((1, 3 * D), lambda b: (0, 0)),       # bqkv
            pl.BlockSpec((D, D), lambda b: (0, 0)),           # wo
            pl.BlockSpec((1, D), lambda b: (0, 0)),           # bo
            pl.BlockSpec((1, D), lambda b: (0, 0)),           # ln1_g
            pl.BlockSpec((1, D), lambda b: (0, 0)),           # ln1_b
            pl.BlockSpec((D, D_FF), lambda b: (0, 0)),        # ff_w1
            pl.BlockSpec((1, D_FF), lambda b: (0, 0)),        # ff_b1
            pl.BlockSpec((D_FF, D), lambda b: (0, 0)),        # ff_w2
            pl.BlockSpec((1, D), lambda b: (0, 0)),           # ff_b2
            pl.BlockSpec((1, D), lambda b: (0, 0)),           # ln2_g
            pl.BlockSpec((1, D), lambda b: (0, 0)),           # ln2_b
        ],
        out_specs=(pl.BlockSpec((1, S, D), lambda b: (b, 0, 0)),
                   pl.BlockSpec((1, H, S, S), lambda b: (b, 0, 0, 0))),
        compiler_params=pltpu.CompilerParams(dimension_semantics=("parallel",)),
    )(x, wqkv, bqkv, p["wo"], p["bo"], p["ln1_g"], p["ln1_b"],
      p["ff_w1"], p["ff_b1"], p["ff_w2"], p["ff_b2"], p["ln2_g"], p["ln2_b"])
    return out, attn


# =====================  pure-JAX reference  =====================

def _ln_ref(y, g, b):
    mu = y.mean(-1, keepdims=True)
    var = ((y - mu) ** 2).mean(-1, keepdims=True)
    return (y - mu) / jnp.sqrt(var + LN_EPS) * g[0] + b[0]


def encoder_layer_ref(x, p):
    B, S, D = x.shape
    H, HD = NUM_HEADS, HEAD_DIM
    q = (x @ p["wq"] + p["bq"][0]).reshape(B, S, H, HD).transpose(0, 2, 1, 3)
    k = (x @ p["wk"] + p["bk"][0]).reshape(B, S, H, HD).transpose(0, 2, 1, 3)
    v = (x @ p["wv"] + p["bv"][0]).reshape(B, S, H, HD).transpose(0, 2, 1, 3)
    scores = jnp.einsum("bhqd,bhkd->bhqk", q, k) / math.sqrt(HD)
    attn = jax.nn.softmax(scores, axis=-1)
    ctx = jnp.einsum("bhqk,bhkd->bhqd", attn, v).transpose(0, 2, 1, 3).reshape(B, S, D)
    att_out = ctx @ p["wo"] + p["bo"][0]
    x = x + _ln_ref(att_out, p["ln1_g"], p["ln1_b"])
    h = jax.nn.relu(x @ p["ff_w1"] + p["ff_b1"][0])
    ff = h @ p["ff_w2"] + p["ff_b2"][0]
    x = x + _ln_ref(ff, p["ln2_g"], p["ln2_b"])
    return x, attn


# =====================  parameter init  =====================

def init_params(key):
    ks = iter(jax.random.split(key, 32))

    def lin(n_in, n_out):
        w = jax.random.normal(next(ks), (n_in, n_out), jnp.float32) * 0.05
        b = jax.random.normal(next(ks), (1, n_out), jnp.float32) * 0.05
        return w, b

    p = {}
    p["wq"], p["bq"] = lin(D_MODEL, D_MODEL)
    p["wk"], p["bk"] = lin(D_MODEL, D_MODEL)
    p["wv"], p["bv"] = lin(D_MODEL, D_MODEL)
    p["wo"], p["bo"] = lin(D_MODEL, D_MODEL)
    p["ff_w1"], p["ff_b1"] = lin(D_MODEL, D_FF)
    p["ff_w2"], p["ff_b2"] = lin(D_FF, D_MODEL)
    for i in (1, 2):
        p[f"ln{i}_g"] = jnp.ones((1, D_MODEL), jnp.float32)
        p[f"ln{i}_b"] = jnp.zeros((1, D_MODEL), jnp.float32)
    return p


# =====================  main  =====================

if __name__ == "__main__":
    key = jax.random.PRNGKey(0)
    kx, kp = jax.random.split(key, 2)
    x = jax.random.normal(kx, (BATCH, SEQ, D_MODEL), jnp.float32)
    params = init_params(kp)

    out, attn = encoder_layer_pallas(x, params)
    out = jax.block_until_ready(out)
    attn = jax.block_until_ready(attn)

    ref_out, ref_attn = encoder_layer_ref(x, params)
    assert out.shape == (BATCH, SEQ, D_MODEL)
    assert attn.shape == (BATCH, NUM_HEADS, SEQ, SEQ)
    assert jnp.allclose(out, ref_out, rtol=1e-4, atol=1e-4)
    assert jnp.allclose(attn, ref_attn, rtol=1e-4, atol=1e-4)

    # TODO(synk): dropout layers are treated as identity (eval mode); no RNG path.
    print("KERNEL_OK")
</pallas_src>

<mosaic_0001>
module attributes {stable_mosaic.version = 11 : i64} {
  func.func @encoder_layer_kernel(%arg0: i32, %arg1: memref<1x8x128xf32, #tpu.memory_space<vmem>>, %arg2: memref<128x384xf32, #tpu.memory_space<vmem>>, %arg3: memref<1x384xf32, #tpu.memory_space<vmem>>, %arg4: memref<128x128xf32, #tpu.memory_space<vmem>>, %arg5: memref<1x128xf32, #tpu.memory_space<vmem>>, %arg6: memref<1x128xf32, #tpu.memory_space<vmem>>, %arg7: memref<1x128xf32, #tpu.memory_space<vmem>>, %arg8: memref<128x256xf32, #tpu.memory_space<vmem>>, %arg9: memref<1x256xf32, #tpu.memory_space<vmem>>, %arg10: memref<256x128xf32, #tpu.memory_space<vmem>>, %arg11: memref<1x128xf32, #tpu.memory_space<vmem>>, %arg12: memref<1x128xf32, #tpu.memory_space<vmem>>, %arg13: memref<1x128xf32, #tpu.memory_space<vmem>>, %arg14: memref<1x8x128xf32, #tpu.memory_space<vmem>>, %arg15: memref<1x4x8x8xf32, #tpu.memory_space<vmem>>) attributes {dimension_semantics = [#tpu.dimension_semantics<parallel>], iteration_bounds = array<i64: 2>, scalar_prefetch = 0 : i64, scratch_operands = 0 : i64, tpu.core_type = #tpu.core_type<tc>, window_params = [{transform_indices = @transform_0, window_bounds = array<i64: 1, 8, 128>}, {pipeline_mode = #tpu.pipeline_mode<synchronous>, transform_indices = @transform_1, window_bounds = array<i64: 128, 384>}, {pipeline_mode = #tpu.pipeline_mode<synchronous>, transform_indices = @transform_2, window_bounds = array<i64: 1, 384>}, {pipeline_mode = #tpu.pipeline_mode<synchronous>, transform_indices = @transform_3, window_bounds = array<i64: 128, 128>}, {pipeline_mode = #tpu.pipeline_mode<synchronous>, transform_indices = @transform_4, window_bounds = array<i64: 1, 128>}, {pipeline_mode = #tpu.pipeline_mode<synchronous>, transform_indices = @transform_5, window_bounds = array<i64: 1, 128>}, {pipeline_mode = #tpu.pipeline_mode<synchronous>, transform_indices = @transform_6, window_bounds = array<i64: 1, 128>}, {pipeline_mode = #tpu.pipeline_mode<synchronous>, transform_indices = @transform_7, window_bounds = array<i64: 128, 256>}, {pipeline_mode = #tpu.pipeline_mode<synchronous>, transform_indices = @transform_8, window_bounds = array<i64: 1, 256>}, {pipeline_mode = #tpu.pipeline_mode<synchronous>, transform_indices = @transform_9, window_bounds = array<i64: 256, 128>}, {pipeline_mode = #tpu.pipeline_mode<synchronous>, transform_indices = @transform_10, window_bounds = array<i64: 1, 128>}, {pipeline_mode = #tpu.pipeline_mode<synchronous>, transform_indices = @transform_11, window_bounds = array<i64: 1, 128>}, {pipeline_mode = #tpu.pipeline_mode<synchronous>, transform_indices = @transform_12, window_bounds = array<i64: 1, 128>}, {transform_indices = @transform_13, window_bounds = array<i64: 1, 8, 128>}, {transform_indices = @transform_14, window_bounds = array<i64: 1, 4, 8, 8>}]} {
    %c0 = arith.constant 0 : index
    %c0_0 = arith.constant 0 : index
    %c0_1 = arith.constant 0 : index
    %0 = vector.load %arg1[%c0, %c0_0, %c0_1] : memref<1x8x128xf32, #tpu.memory_space<vmem>>, vector<1x8x128xf32>
    %1 = vector.shape_cast %0 : vector<1x8x128xf32> to vector<8x128xf32>
    %c0_2 = arith.constant 0 : index
    %c0_3 = arith.constant 0 : index
    %2 = vector.load %arg2[%c0_2, %c0_3] : memref<128x384xf32, #tpu.memory_space<vmem>>, vector<128x384xf32>
    %cst = arith.constant dense<0.000000e+00> : vector<8x384xf32>
    %3 = tpu.matmul %1, %2, %cst {dimension_numbers = #tpu.dot_dimension_numbers<[1], [0], [0], [1], [0, 0, 1, 1], [], []>} : vector<8x128xf32>, vector<128x384xf32>, vector<8x384xf32> -> vector<8x384xf32>
    %c0_4 = arith.constant 0 : index
    %c0_5 = arith.constant 0 : index
    %4 = vector.load %arg3[%c0_4, %c0_5] : memref<1x384xf32, #tpu.memory_space<vmem>>, vector<1x384xf32>
    %5 = vector.broadcast %4 : vector<1x384xf32> to vector<8x384xf32>
    %6 = arith.addf %3, %5 : vector<8x384xf32>
    %7 = vector.extract_strided_slice %6 {offsets = [0, 0], sizes = [8, 128], strides = [1, 1]} : vector<8x384xf32> to vector<8x128xf32>
    %cst_6 = arith.constant 0.176776692 : f32
    %8 = vector.broadcast %cst_6 : f32 to vector<8x128xf32>
    %9 = arith.mulf %7, %8 : vector<8x128xf32>
    %10 = vector.extract_strided_slice %6 {offsets = [0, 128], sizes = [8, 128], strides = [1, 1]} : vector<8x384xf32> to vector<8x128xf32>
    %11 = vector.extract_strided_slice %6 {offsets = [0, 256], sizes = [8, 128], strides = [1, 1]} : vector<8x384xf32> to vector<8x128xf32>
    %12 = vector.extract_strided_slice %9 {offsets = [0, 0], sizes = [8, 32], strides = [1, 1]} : vector<8x128xf32> to vector<8x32xf32>
    %13 = vector.extract_strided_slice %10 {offsets = [0, 0], sizes = [8, 32], strides = [1, 1]} : vector<8x128xf32> to vector<8x32xf32>
    %14 = tpu.transpose %13, [1, 0] : vector<8x32xf32> -> vector<32x8xf32>
    %cst_7 = arith.constant dense<0.000000e+00> : vector<8x8xf32>
    %15 = tpu.matmul %12, %14, %cst_7 {dimension_numbers = #tpu.dot_dimension_numbers<[1], [0], [0], [1], [0, 0, 1, 1], [], []>} : vector<8x32xf32>, vector<32x8xf32>, vector<8x8xf32> -> vector<8x8xf32>
    %cst_8 = arith.constant dense<0xFF800000> : vector<8xf32>
    %16 = vector.multi_reduction <maximumf>, %15, %cst_8 [1] : vector<8x8xf32> to vector<8xf32>
    %17 = vector.shape_cast %16 : vector<8xf32> to vector<8x1xf32>
    %18 = vector.broadcast %17 : vector<8x1xf32> to vector<8x8xf32>
    %19 = arith.subf %15, %18 : vector<8x8xf32>
    %20 = math.exp %19 : vector<8x8xf32>
    %cst_9 = arith.constant dense<0.000000e+00> : vector<8xf32>
    %21 = vector.multi_reduction <add>, %20, %cst_9 [1] : vector<8x8xf32> to vector<8xf32>
    %22 = vector.shape_cast %21 : vector<8xf32> to vector<8x1xf32>
    %23 = vector.broadcast %22 : vector<8x1xf32> to vector<8x8xf32>
    %24 = arith.divf %20, %23 : vector<8x8xf32>
    %25 = vector.extract_strided_slice %11 {offsets = [0, 0], sizes = [8, 32], strides = [1, 1]} : vector<8x128xf32> to vector<8x32xf32>
    %cst_10 = arith.constant dense<0.000000e+00> : vector<8x32xf32>
    %26 = tpu.matmul %24, %25, %cst_10 {dimension_numbers = #tpu.dot_dimension_numbers<[1], [0], [0], [1], [0, 0, 1, 1], [], []>} : vector<8x8xf32>, vector<8x32xf32>, vector<8x32xf32> -> vector<8x32xf32>
    %27 = vector.extract_strided_slice %9 {offsets = [0, 32], sizes = [8, 32], strides = [1, 1]} : vector<8x128xf32> to vector<8x32xf32>
    %28 = vector.extract_strided_slice %10 {offsets = [0, 32], sizes = [8, 32], strides = [1, 1]} : vector<8x128xf32> to vector<8x32xf32>
    %29 = tpu.transpose %28, [1, 0] : vector<8x32xf32> -> vector<32x8xf32>
    %cst_11 = arith.constant dense<0.000000e+00> : vector<8x8xf32>
    %30 = tpu.matmul %27, %29, %cst_11 {dimension_numbers = #tpu.dot_dimension_numbers<[1], [0], [0], [1], [0, 0, 1, 1], [], []>} : vector<8x32xf32>, vector<32x8xf32>, vector<8x8xf32> -> vector<8x8xf32>
    %cst_12 = arith.constant dense<0xFF800000> : vector<8xf32>
    %31 = vector.multi_reduction <maximumf>, %30, %cst_12 [1] : vector<8x8xf32> to vector<8xf32>
    %32 = vector.shape_cast %31 : vector<8xf32> to vector<8x1xf32>
    %33 = vector.broadcast %32 : vector<8x1xf32> to vector<8x8xf32>
    %34 = arith.subf %30, %33 : vector<8x8xf32>
    %35 = math.exp %34 : vector<8x8xf32>
    %cst_13 = arith.constant dense<0.000000e+00> : vector<8xf32>
    %36 = vector.multi_reduction <add>, %35, %cst_13 [1] : vector<8x8xf32> to vector<8xf32>
    %37 = vector.shape_cast %36 : vector<8xf32> to vector<8x1xf32>
    %38 = vector.broadcast %37 : vector<8x1xf32> to vector<8x8xf32>
    %39 = arith.divf %35, %38 : vector<8x8xf32>
    %40 = vector.extract_strided_slice %11 {offsets = [0, 32], sizes = [8, 32], strides = [1, 1]} : vector<8x128xf32> to vector<8x32xf32>
    %cst_14 = arith.constant dense<0.000000e+00> : vector<8x32xf32>
    %41 = tpu.matmul %39, %40, %cst_14 {dimension_numbers = #tpu.dot_dimension_numbers<[1], [0], [0], [1], [0, 0, 1, 1], [], []>} : vector<8x8xf32>, vector<8x32xf32>, vector<8x32xf32> -> vector<8x32xf32>
    %42 = vector.extract_strided_slice %9 {offsets = [0, 64], sizes = [8, 32], strides = [1, 1]} : vector<8x128xf32> to vector<8x32xf32>
    %43 = vector.extract_strided_slice %10 {offsets = [0, 64], sizes = [8, 32], strides = [1, 1]} : vector<8x128xf32> to vector<8x32xf32>
    %44 = tpu.transpose %43, [1, 0] : vector<8x32xf32> -> vector<32x8xf32>
    %cst_15 = arith.constant dense<0.000000e+00> : vector<8x8xf32>
    %45 = tpu.matmul %42, %44, %cst_15 {dimension_numbers = #tpu.dot_dimension_numbers<[1], [0], [0], [1], [0, 0, 1, 1], [], []>} : vector<8x32xf32>, vector<32x8xf32>, vector<8x8xf32> -> vector<8x8xf32>
    %cst_16 = arith.constant dense<0xFF800000> : vector<8xf32>
    %46 = vector.multi_reduction <maximumf>, %45, %cst_16 [1] : vector<8x8xf32> to vector<8xf32>
    %47 = vector.shape_cast %46 : vector<8xf32> to vector<8x1xf32>
    %48 = vector.broadcast %47 : vector<8x1xf32> to vector<8x8xf32>
    %49 = arith.subf %45, %48 : vector<8x8xf32>
    %50 = math.exp %49 : vector<8x8xf32>
    %cst_17 = arith.constant dense<0.000000e+00> : vector<8xf32>
    %51 = vector.multi_reduction <add>, %50, %cst_17 [1] : vector<8x8xf32> to vector<8xf32>
    %52 = vector.shape_cast %51 : vector<8xf32> to vector<8x1xf32>
    %53 = vector.broadcast %52 : vector<8x1xf32> to vector<8x8xf32>
    %54 = arith.divf %50, %53 : vector<8x8xf32>
    %55 = vector.extract_strided_slice %11 {offsets = [0, 64], sizes = [8, 32], strides = [1, 1]} : vector<8x128xf32> to vector<8x32xf32>
    %cst_18 = arith.constant dense<0.000000e+00> : vector<8x32xf32>
    %56 = tpu.matmul %54, %55, %cst_18 {dimension_numbers = #tpu.dot_dimension_numbers<[1], [0], [0], [1], [0, 0, 1, 1], [], []>} : vector<8x8xf32>, vector<8x32xf32>, vector<8x32xf32> -> vector<8x32xf32>
    %57 = vector.extract_strided_slice %9 {offsets = [0, 96], sizes = [8, 32], strides = [1, 1]} : vector<8x128xf32> to vector<8x32xf32>
    %58 = vector.extract_strided_slice %10 {offsets = [0, 96], sizes = [8, 32], strides = [1, 1]} : vector<8x128xf32> to vector<8x32xf32>
    %59 = tpu.transpose %58, [1, 0] : vector<8x32xf32> -> vector<32x8xf32>
    %cst_19 = arith.constant dense<0.000000e+00> : vector<8x8xf32>
    %60 = tpu.matmul %57, %59, %cst_19 {dimension_numbers = #tpu.dot_dimension_numbers<[1], [0], [0], [1], [0, 0, 1, 1], [], []>} : vector<8x32xf32>, vector<32x8xf32>, vector<8x8xf32> -> vector<8x8xf32>
    %cst_20 = arith.constant dense<0xFF800000> : vector<8xf32>
    %61 = vector.multi_reduction <maximumf>, %60, %cst_20 [1] : vector<8x8xf32> to vector<8xf32>
    %62 = vector.shape_cast %61 : vector<8xf32> to vector<8x1xf32>
    %63 = vector.broadcast %62 : vector<8x1xf32> to vector<8x8xf32>
    %64 = arith.subf %60, %63 : vector<8x8xf32>
    %65 = math.exp %64 : vector<8x8xf32>
    %cst_21 = arith.constant dense<0.000000e+00> : vector<8xf32>
    %66 = vector.multi_reduction <add>, %65, %cst_21 [1] : vector<8x8xf32> to vector<8xf32>
    %67 = vector.shape_cast %66 : vector<8xf32> to vector<8x1xf32>
    %68 = vector.broadcast %67 : vector<8x1xf32> to vector<8x8xf32>
    %69 = arith.divf %65, %68 : vector<8x8xf32>
    %70 = vector.extract_strided_slice %11 {offsets = [0, 96], sizes = [8, 32], strides = [1, 1]} : vector<8x128xf32> to vector<8x32xf32>
    %cst_22 = arith.constant dense<0.000000e+00> : vector<8x32xf32>
    %71 = tpu.matmul %69, %70, %cst_22 {dimension_numbers = #tpu.dot_dimension_numbers<[1], [0], [0], [1], [0, 0, 1, 1], [], []>} : vector<8x8xf32>, vector<8x32xf32>, vector<8x32xf32> -> vector<8x32xf32>
    %72 = vector.shape_cast %24 : vector<8x8xf32> to vector<1x8x8xf32>
    %73 = vector.shape_cast %39 : vector<8x8xf32> to vector<1x8x8xf32>
    %74 = vector.shape_cast %54 : vector<8x8xf32> to vector<1x8x8xf32>
    %75 = vector.shape_cast %69 : vector<8x8xf32> to vector<1x8x8xf32>
    %76 = tpu.concatenate %72, %73, %74, %75 in 0 : vector<1x8x8xf32>, vector<1x8x8xf32>, vector<1x8x8xf32>, vector<1x8x8xf32> -> vector<4x8x8xf32>
    %c0_23 = arith.constant 0 : index
    %c0_24 = arith.constant 0 : index
    %c0_25 = arith.constant 0 : index
    %c0_26 = arith.constant 0 : index
    %77 = vector.load %arg15[%c0_23, %c0_24, %c0_25, %c0_26] : memref<1x4x8x8xf32, #tpu.memory_space<vmem>>, vector<1x4x8x8xf32>
    %78 = vector.shape_cast %77 : vector<1x4x8x8xf32> to vector<4x8x8xf32>
    %79 = vector.shape_cast %76 : vector<4x8x8xf32> to vector<1x4x8x8xf32>
    tpu.vector_store %arg15[%c0_23, %c0_24, %c0_25, %c0_26], %79 {strides = array<i32>} : memref<1x4x8x8xf32, #tpu.memory_space<vmem>>, vector<1x4x8x8xf32>,
    %80 = tpu.concatenate %26, %41, %56, %71 in 1 : vector<8x32xf32>, vector<8x32xf32>, vector<8x32xf32>, vector<8x32xf32> -> vector<8x128xf32>
    %c0_27 = arith.constant 0 : index
    %c0_28 = arith.constant 0 : index
    %81 = vector.load %arg4[%c0_27, %c0_28] : memref<128x128xf32, #tpu.memory_space<vmem>>, vector<128x128xf32>
    %cst_29 = arith.constant dense<0.000000e+00> : vector<8x128xf32>
    %82 = tpu.matmul %80, %81, %cst_29 {dimension_numbers = #tpu.dot_dimension_numbers<[1], [0], [0], [1], [0, 0, 1, 1], [], []>} : vector<8x128xf32>, vector<128x128xf32>, vector<8x128xf32> -> vector<8x128xf32>
    %c0_30 = arith.constant 0 : index
    %c0_31 = arith.constant 0 : index
    %83 = vector.load %arg5[%c0_30, %c0_31] : memref<1x128xf32, #tpu.memory_space<vmem>>, vector<1x128xf32>
    %84 = vector.broadcast %83 : vector<1x128xf32> to vector<8x128xf32>
    %85 = arith.addf %82, %84 : vector<8x128xf32>
    %c0_32 = arith.constant 0 : index
    %c0_33 = arith.constant 0 : index
    %86 = vector.load %arg6[%c0_32, %c0_33] : memref<1x128xf32, #tpu.memory_space<vmem>>, vector<1x128xf32>
    %c0_34 = arith.constant 0 : index
    %c0_35 = arith.constant 0 : index
    %87 = vector.load %arg7[%c0_34, %c0_35] : memref<1x128xf32, #tpu.memory_space<vmem>>, vector<1x128xf32>
    %cst_36 = arith.constant dense<0.000000e+00> : vector<8xf32>
    %88 = vector.multi_reduction <add>, %85, %cst_36 [1] : vector<8x128xf32> to vector<8xf32>
    %89 = vector.shape_cast %88 : vector<8xf32> to vector<8x1xf32>
    %cst_37 = arith.constant 1.280000e+02 : f32
    %90 = vector.broadcast %cst_37 : f32 to vector<8x1xf32>
    %91 = arith.divf %89, %90 : vector<8x1xf32>
    %92 = vector.broadcast %91 : vector<8x1xf32> to vector<8x128xf32>
    %93 = arith.subf %85, %92 : vector<8x128xf32>
    %94 = arith.mulf %93, %93 : vector<8x128xf32>
    %cst_38 = arith.constant dense<0.000000e+00> : vector<8xf32>
    %95 = vector.multi_reduction <add>, %94, %cst_38 [1] : vector<8x128xf32> to vector<8xf32>
    %96 = vector.shape_cast %95 : vector<8xf32> to vector<8x1xf32>
    %cst_39 = arith.constant 1.280000e+02 : f32
    %97 = vector.broadcast %cst_39 : f32 to vector<8x1xf32>
    %98 = arith.divf %96, %97 : vector<8x1xf32>
    %99 = vector.broadcast %91 : vector<8x1xf32> to vector<8x128xf32>
    %100 = arith.subf %85, %99 : vector<8x128xf32>
    %cst_40 = arith.constant 9.99999974E-6 : f32
    %101 = vector.broadcast %cst_40 : f32 to vector<8x1xf32>
    %102 = arith.addf %98, %101 : vector<8x1xf32>
    %103 = math.rsqrt %102 : vector<8x1xf32>
    %104 = vector.broadcast %103 : vector<8x1xf32> to vector<8x128xf32>
    %105 = arith.mulf %100, %104 : vector<8x128xf32>
    %106 = vector.broadcast %86 : vector<1x128xf32> to vector<8x128xf32>
    %107 = arith.mulf %105, %106 : vector<8x128xf32>
    %108 = vector.broadcast %87 : vector<1x128xf32> to vector<8x128xf32>
    %109 = arith.addf %107, %108 : vector<8x128xf32>
    %110 = arith.addf %1, %109 : vector<8x128xf32>
    %c0_41 = arith.constant 0 : index
    %c0_42 = arith.constant 0 : index
    %111 = vector.load %arg8[%c0_41, %c0_42] : memref<128x256xf32, #tpu.memory_space<vmem>>, vector<128x256xf32>
    %cst_43 = arith.constant dense<0.000000e+00> : vector<8x256xf32>
    %112 = tpu.matmul %110, %111, %cst_43 {dimension_numbers = #tpu.dot_dimension_numbers<[1], [0], [0], [1], [0, 0, 1, 1], [], []>} : vector<8x128xf32>, vector<128x256xf32>, vector<8x256xf32> -> vector<8x256xf32>
    %c0_44 = arith.constant 0 : index
    %c0_45 = arith.constant 0 : index
    %113 = vector.load %arg9[%c0_44, %c0_45] : memref<1x256xf32, #tpu.memory_space<vmem>>, vector<1x256xf32>
    %114 = vector.broadcast %113 : vector<1x256xf32> to vector<8x256xf32>
    %115 = arith.addf %112, %114 : vector<8x256xf32>
    %cst_46 = arith.constant 0.000000e+00 : f32
    %116 = vector.broadcast %cst_46 : f32 to vector<8x256xf32>
    %117 = arith.maximumf %115, %116 : vector<8x256xf32>
    %c0_47 = arith.constant 0 : index
    %c0_48 = arith.constant 0 : index
    %118 = vector.load %arg10[%c0_47, %c0_48] : memref<256x128xf32, #tpu.memory_space<vmem>>, vector<256x128xf32>
    %cst_49 = arith.constant dense<0.000000e+00> : vector<8x128xf32>
    %119 = tpu.matmul %117, %118, %cst_49 {dimension_numbers = #tpu.dot_dimension_numbers<[1], [0], [0], [1], [0, 0, 1, 1], [], []>} : vector<8x256xf32>, vector<256x128xf32>, vector<8x128xf32> -> vector<8x128xf32>
    %c0_50 = arith.constant 0 : index
    %c0_51 = arith.constant 0 : index
    %120 = vector.load %arg11[%c0_50, %c0_51] : memref<1x128xf32, #tpu.memory_space<vmem>>, vector<1x128xf32>
    %121 = vector.broadcast %120 : vector<1x128xf32> to vector<8x128xf32>
    %122 = arith.addf %119, %121 : vector<8x128xf32>
    %c0_52 = arith.constant 0 : index
    %c0_53 = arith.constant 0 : index
    %123 = vector.load %arg12[%c0_52, %c0_53] : memref<1x128xf32, #tpu.memory_space<vmem>>, vector<1x128xf32>
    %c0_54 = arith.constant 0 : index
    %c0_55 = arith.constant 0 : index
    %124 = vector.load %arg13[%c0_54, %c0_55] : memref<1x128xf32, #tpu.memory_space<vmem>>, vector<1x128xf32>
    %cst_56 = arith.constant dense<0.000000e+00> : vector<8xf32>
    %125 = vector.multi_reduction <add>, %122, %cst_56 [1] : vector<8x128xf32> to vector<8xf32>
    %126 = vector.shape_cast %125 : vector<8xf32> to vector<8x1xf32>
    %cst_57 = arith.constant 1.280000e+02 : f32
    %127 = vector.broadcast %cst_57 : f32 to vector<8x1xf32>
    %128 = arith.divf %126, %127 : vector<8x1xf32>
    %129 = vector.broadcast %128 : vector<8x1xf32> to vector<8x128xf32>
    %130 = arith.subf %122, %129 : vector<8x128xf32>
    %131 = arith.mulf %130, %130 : vector<8x128xf32>
    %cst_58 = arith.constant dense<0.000000e+00> : vector<8xf32>
    %132 = vector.multi_reduction <add>, %131, %cst_58 [1] : vector<8x128xf32> to vector<8xf32>
    %133 = vector.shape_cast %132 : vector<8xf32> to vector<8x1xf32>
    %cst_59 = arith.constant 1.280000e+02 : f32
    %134 = vector.broadcast %cst_59 : f32 to vector<8x1xf32>
    %135 = arith.divf %133, %134 : vector<8x1xf32>
    %136 = vector.broadcast %128 : vector<8x1xf32> to vector<8x128xf32>
    %137 = arith.subf %122, %136 : vector<8x128xf32>
    %cst_60 = arith.constant 9.99999974E-6 : f32
    %138 = vector.broadcast %cst_60 : f32 to vector<8x1xf32>
    %139 = arith.addf %135, %138 : vector<8x1xf32>
    %140 = math.rsqrt %139 : vector<8x1xf32>
    %141 = vector.broadcast %140 : vector<8x1xf32> to vector<8x128xf32>
    %142 = arith.mulf %137, %141 : vector<8x128xf32>
    %143 = vector.broadcast %123 : vector<1x128xf32> to vector<8x128xf32>
    %144 = arith.mulf %142, %143 : vector<8x128xf32>
    %145 = vector.broadcast %124 : vector<1x128xf32> to vector<8x128xf32>
    %146 = arith.addf %144, %145 : vector<8x128xf32>
    %147 = arith.addf %110, %146 : vector<8x128xf32>
    %c0_61 = arith.constant 0 : index
    %c0_62 = arith.constant 0 : index
    %c0_63 = arith.constant 0 : index
    %148 = vector.load %arg14[%c0_61, %c0_62, %c0_63] : memref<1x8x128xf32, #tpu.memory_space<vmem>>, vector<1x8x128xf32>
    %149 = vector.shape_cast %148 : vector<1x8x128xf32> to vector<8x128xf32>
    %150 = vector.shape_cast %147 : vector<8x128xf32> to vector<1x8x128xf32>
    tpu.vector_store %arg14[%c0_61, %c0_62, %c0_63], %150 {strides = array<i32>} : memref<1x8x128xf32, #tpu.memory_space<vmem>>, vector<1x8x128xf32>,
    return
  }
  func.func @transform_0(%arg0: i32) -> (i32, i32, i32) {
    %c0_i32 = arith.constant 0 : i32
    %c0_i32_0 = arith.constant 0 : i32
    %c0_i32_1 = arith.constant 0 : i32
    return %arg0, %c0_i32, %c0_i32_0 : i32, i32, i32
  }
  func.func @transform_1(%arg0: i32) -> (i32, i32) {
    %c0_i32 = arith.constant 0 : i32
    %c0_i32_0 = arith.constant 0 : i32
    %c0_i32_1 = arith.constant 0 : i32
    return %c0_i32, %c0_i32_0 : i32, i32
  }
  func.func @transform_2(%arg0: i32) -> (i32, i32) {
    %c0_i32 = arith.constant 0 : i32
    %c0_i32_0 = arith.constant 0 : i32
    %c0_i32_1 = arith.constant 0 : i32
    return %c0_i32, %c0_i32_0 : i32, i32
  }
  func.func @transform_3(%arg0: i32) -> (i32, i32) {
    %c0_i32 = arith.constant 0 : i32
    %c0_i32_0 = arith.constant 0 : i32
    %c0_i32_1 = arith.constant 0 : i32
    return %c0_i32, %c0_i32_0 : i32, i32
  }
  func.func @transform_4(%arg0: i32) -> (i32, i32) {
    %c0_i32 = arith.constant 0 : i32
    %c0_i32_0 = arith.constant 0 : i32
    %c0_i32_1 = arith.constant 0 : i32
    return %c0_i32, %c0_i32_0 : i32, i32
  }
  func.func @transform_5(%arg0: i32) -> (i32, i32) {
    %c0_i32 = arith.constant 0 : i32
    %c0_i32_0 = arith.constant 0 : i32
    %c0_i32_1 = arith.constant 0 : i32
    return %c0_i32, %c0_i32_0 : i32, i32
  }
  func.func @transform_6(%arg0: i32) -> (i32, i32) {
    %c0_i32 = arith.constant 0 : i32
    %c0_i32_0 = arith.constant 0 : i32
    %c0_i32_1 = arith.constant 0 : i32
    return %c0_i32, %c0_i32_0 : i32, i32
  }
  func.func @transform_7(%arg0: i32) -> (i32, i32) {
    %c0_i32 = arith.constant 0 : i32
    %c0_i32_0 = arith.constant 0 : i32
    %c0_i32_1 = arith.constant 0 : i32
    return %c0_i32, %c0_i32_0 : i32, i32
  }
  func.func @transform_8(%arg0: i32) -> (i32, i32) {
    %c0_i32 = arith.constant 0 : i32
    %c0_i32_0 = arith.constant 0 : i32
    %c0_i32_1 = arith.constant 0 : i32
    return %c0_i32, %c0_i32_0 : i32, i32
  }
  func.func @transform_9(%arg0: i32) -> (i32, i32) {
    %c0_i32 = arith.constant 0 : i32
    %c0_i32_0 = arith.constant 0 : i32
    %c0_i32_1 = arith.constant 0 : i32
    return %c0_i32, %c0_i32_0 : i32, i32
  }
  func.func @transform_10(%arg0: i32) -> (i32, i32) {
    %c0_i32 = arith.constant 0 : i32
    %c0_i32_0 = arith.constant 0 : i32
    %c0_i32_1 = arith.constant 0 : i32
    return %c0_i32, %c0_i32_0 : i32, i32
  }
  func.func @transform_11(%arg0: i32) -> (i32, i32) {
    %c0_i32 = arith.constant 0 : i32
    %c0_i32_0 = arith.constant 0 : i32
    %c0_i32_1 = arith.constant 0 : i32
    return %c0_i32, %c0_i32_0 : i32, i32
  }
  func.func @transform_12(%arg0: i32) -> (i32, i32) {
    %c0_i32 = arith.constant 0 : i32
    %c0_i32_0 = arith.constant 0 : i32
    %c0_i32_1 = arith.constant 0 : i32
    return %c0_i32, %c0_i32_0 : i32, i32
  }
  func.func @transform_13(%arg0: i32) -> (i32, i32, i32) {
    %c0_i32 = arith.constant 0 : i32
    %c0_i32_0 = arith.constant 0 : i32
    %c0_i32_1 = arith.constant 0 : i32
    return %arg0, %c0_i32, %c0_i32_0 : i32, i32, i32
  }
  func.func @transform_14(%arg0: i32) -> (i32, i32, i32, i32) {
    %c0_i32 = arith.constant 0 : i32
    %c0_i32_0 = arith.constant 0 : i32
    %c0_i32_1 = arith.constant 0 : i32
    %c0_i32_2 = arith.constant 0 : i32
    return %arg0, %c0_i32, %c0_i32_0, %c0_i32_1 : i32, i32, i32, i32
  }
}

</mosaic_0001>

<bundles_post_ra>
// kernel: tpu_custom_call.1
= control target key start
LH: loop header
LB: loop body
LE: loop exit
PB: predicated region body
PF: predicated region fallthrough
CT: control target
= control target key end

     0   :  { %s3323_s0 = inlined_call_operand.hbm [shape: f32[2,8,128], index: 0, kind: input, shape index: {}]   ;;  %s3324_s1 = inlined_call_operand.hbm [shape: f32[128,384], index: 1, kind: input, shape index: {}]   ;;  %s3325_s2 = inlined_call_operand.vmem [shape: f32[1,384], index: 2, kind: input, shape index: {}]   ;;  %s3326_s3 = inlined_call_operand.hbm [shape: f32[128,128], index: 3, kind: input, shape index: {}]   ;;  %s3327_s4 = inlined_call_operand.vmem [shape: f32[1,128], index: 4, kind: input, shape index: {}]   ;;  %s3328_s5 = inlined_call_operand.vmem [shape: f32[1,128], index: 5, kind: input, shape index: {}]   ;;  %s3329_s6 = inlined_call_operand.vmem [shape: f32[1,128], index: 6, kind: input, shape index: {}]   ;;  %s3330_s7 = inlined_call_operand.hbm [shape: f32[128,256], index: 7, kind: input, shape index: {}]   ;;  %s3331_s8 = inlined_call_operand.vmem [shape: f32[1,256], index: 8, kind: input, shape index: {}]   ;;  %s3332_s9 = inlined_call_operand.hbm [shape: f32[256,128], index: 9, kind: input, shape index: {}]   ;;  %s3333_s10 = inlined_call_operand.vmem [shape: f32[1,128], index: 10, kind: input, shape index: {}]   ;;  %s3334_s11 = inlined_call_operand.vmem [shape: f32[1,128], index: 11, kind: input, shape index: {}]   ;;  %s3335_s12 = inlined_call_operand.vmem [shape: f32[1,128], index: 12, kind: input, shape index: {}]   ;;  %s3336_s13 = inlined_call_operand.hbm [shape: f32[2,8,128], index: 13, kind: output, shape index: {0}]   ;;  %s3337_s14 = inlined_call_operand.hbm [shape: f32[2,4,8,8], index: 14, kind: output, shape index: {1}]  }
   0x1   :  { %3344 = sst [smem:[#allocation19_spill]] %s3323_s0 }
   0x2   :  { %3345 = sst [smem:[#allocation20_spill]] %s3324_s1 }
   0x3   :  { %3346 = sst [smem:[#allocation21_spill]] %s3325_s2 }
   0x4   :  { %3347 = sst [smem:[#allocation22_spill]] %s3331_s8 }
   0x5   :  { %3348 = sst [smem:[#allocation23_spill]] %s3333_s10 }
   0x6   :  { %3349 = sst [smem:[#allocation24_spill]] %s3334_s11 }
   0x7   :  { %3350 = sst [smem:[#allocation25_spill]] %s3335_s12 }
   0x8   :  { %3351 = sst [smem:[#allocation26_spill]] %s3336_s13 }
   0x9   :  { %3352 = sst [smem:[#allocation27_spill]] %s3337_s14 }
   0xa   :  { %20 = vsyncpa [#allocation3], 0 }
   0xb   :  { %22 = vsyncpa [#allocation3 + $0x1], 0 }
   0xc   :  { %23 = vsyncpa [#allocation6], 0 }
   0xd   :  { %24 = vsyncpa [#allocation9], 0 }
   0xe   :  { %25 = vsyncpa [#allocation4], 0 }
   0xf   :  { %27 = vsyncpa [#allocation4 + $0x1], 0 }
  0x10   :  { %28 = vsyncpa [#allocation13], 0 }
  0x11   :  { %30 = vsyncpa [#allocation13 + $0x1], 0  ;;  %s2845_s29 = smov 0   ;;  %s2847_s30 = smov 0  }
  0x12   :  { %s2849_s15 = smov 0   ;;  %s2851_s16 = smov 0  }
  0x13 LB: > { %s2749_s17 = smov [#allocation5]   ;;  %s2866_s19 = sadd.s32 4294967295, %s2747_s16   ;;  %s2747_s16 = sphi %s2851_s16, %s3383_s16   ;;  %s2743_s15 = sphi %s2849_s15, %s3382_s15   ;;  %s2739_s30 = sphi %s2847_s30, %s3381_s30   ;;  %s2735_s29 = sphi %s2845_s29, %s3380_s29  }
  0x14   : > { %s383_s18 = sshll.u32 %s2749_s17, 4  ;;  %p1992_p0 = scmp.ge.s32.totalorder %s2747_s16, 1  ;;  %s2871_s18 = int_to_ptr.vmem [resolvable:$true] %s383_s18 }
  0x15   : > { %p3340_p1 = scmp.eq.s32.totalorder %s2866_s19, 0  ;;  %p371_p2 = scmp.lt.s32.totalorder %s2747_s16, 3 }
  0x16   : > { %s2750_s21 = smov [#allocation8]   ;;  %s2751_s24 = smov [#allocation7]  }
  0x17   : > { %p2873_p3 = pnand %p1992_p0, %p371_p2  ;;  %s421_s22 = sshll.u32 %s2750_s21, 4  ;;  %s2886_s22 = int_to_ptr.vmem [resolvable:$true] %s421_s22 }
  0x18   : > { %s2888_s25 = sshll.u32 %s2751_s24, 4  ;;  %s3355_s1 = sld [smem:[#allocation20_spill]]  ;;  %s400_s25 = int_to_ptr.vmem [resolvable:$true] %s2888_s25 }
  0x19   : > { %s3353_s20 = scalar_select %p2873_p3, 1, 0 }
  0x1a   : > { %p2395_p5 = pneg %p2873_p3 }
  0x1c   : > { %p2882_p6 = pnand %p2395_p5, %p3340_p1 }
  0x1e   : > { %s2499_s28 = scalar_lea.hbm %s3355_s1, 6144  ;;  %p2898_p8 = pneg %p2882_p6 }
  0x1f   : > { %p2500_p7 = scmp.ne.s32.totalorder %s3355_s1, %s2499_s28  ;;  %p2506_p11 = scmp.lt.u32.totalorder %s2499_s28, %s3355_s1 }
  0x21   : > { %p2502_p9 = pnand %p2898_p8, %p2500_p7 }
  0x23   : > { %p2503_p10 = pneg %p2502_p9 }
  0x25   : > { %p2508_p12 = pnand %p2506_p11, %p2503_p10 }
  0x27   : > { %2511 = shalt.err (!%p2508_p12)
}
  0x28   : > { %s2512_s13 = scalar_lea.vmem %s2871_s18, 6144  ;;  %p2520_p5 = scmp.lt.s32.totalorder %s2871_s18, %s2871_s18 }
  0x29   : > { %p2513_p13 = scmp.ne.s32.totalorder %s2871_s18, %s2512_s13  ;;  %p2521_p4 = scmp.lt.s32.totalorder %s2512_s13, %s2512_s13 }
  0x2b   : > { %p2515_p0 = pnand %p2513_p13, %p2898_p8  ;;  %p2522_p7 = por %p2521_p4, %p2520_p5 }
  0x2d   : > { %p2516_p2 = pneg %p2515_p0 }
  0x2f   : > { %p2523_p9 = pnand %p2522_p7, %p2516_p2 }
  0x31   : > { %2526 = shalt.err (!%p2523_p9)
}
  0x32   : > { %s2752_s26 = smov 384   ;;  %s2753_s12 = smov 24  }
  0x33   : > { %2398 = dma.hbm_to_vmem [thread:$0]  (!%p2882_p6), %s3355_s1, 6144, %s2871_s18, [#allocation6], %s2752_s26, %s2752_s26, %s2753_s12  }
  0x34   : > { %s2527_s11 = scalar_lea.hbm %s3330_s7, 4096 }
  0x35   : > { %p2528_p4 = scmp.ne.s32.totalorder %s3330_s7, %s2527_s11  ;;  %p2534_p12 = scmp.lt.u32.totalorder %s2527_s11, %s3330_s7 }
  0x37   : > { %p2530_p10 = pnand %p2528_p4, %p2898_p8 }
  0x39   : > { %p2531_p11 = pneg %p2530_p10 }
  0x3b   : > { %p2536_p13 = pnand %p2534_p12, %p2531_p11 }
  0x3d   : > { %2539 = shalt.err (!%p2536_p13)
}
  0x3e   : > { %s2540_s18 = scalar_lea.vmem %s2886_s22, 4096  ;;  %p2548_p7 = scmp.lt.s32.totalorder %s2886_s22, %s2886_s22 }
  0x3f   : > { %p2541_p0 = scmp.ne.s32.totalorder %s2886_s22, %s2540_s18  ;;  %p2549_p9 = scmp.lt.s32.totalorder %s2540_s18, %s2540_s18 }
  0x41   : > { %p2543_p2 = pnand %p2541_p0, %p2898_p8  ;;  %p2550_p4 = por %p2549_p9, %p2548_p7 }
  0x43   : > { %p2544_p5 = pneg %p2543_p2 }
  0x45   : > { %p2551_p10 = pnand %p2550_p4, %p2544_p5 }
  0x47   : > { %2554 = shalt.err (!%p2551_p10)
}
  0x48   : > { %s2754_s10 = smov 256   ;;  %s2755_s8 = smov 16  }
  0x49   : > { %2404 = dma.hbm_to_vmem [thread:$0]  (!%p2882_p6), %s3330_s7, 4096, %s2886_s22, [#allocation9], %s2754_s10, %s2754_s10, %s2755_s8  }
  0x4a   : > { %s2555_s27 = scalar_lea.hbm %s3326_s3, 2048 }
  0x4b   : > { %p2556_p11 = scmp.ne.s32.totalorder %s3326_s3, %s2555_s27  ;;  %p2562_p0 = scmp.lt.u32.totalorder %s2555_s27, %s3326_s3 }
  0x4d   : > { %p2558_p12 = pnand %p2556_p11, %p2898_p8 }
  0x4f   : > { %p2559_p13 = pneg %p2558_p12 }
  0x51   : > { %p2564_p2 = pnand %p2562_p0, %p2559_p13 }
  0x53   : > { %2567 = shalt.err (!%p2564_p2)
}
  0x54   : > { %s2568_s18 = scalar_lea.vmem %s400_s25, 2048  ;;  %p2576_p4 = scmp.lt.s32.totalorder %s400_s25, %s400_s25 }
  0x55   : > { %p2569_p5 = scmp.ne.s32.totalorder %s400_s25, %s2568_s18  ;;  %p2577_p10 = scmp.lt.s32.totalorder %s2568_s18, %s2568_s18 }
  0x57   : > { %p2571_p7 = pnand %p2569_p5, %p2898_p8  ;;  %p2578_p1 = por %p2577_p10, %p2576_p4 }
  0x59   : > { %p2572_p9 = pneg %p2571_p7 }
  0x5b   : > { %p2579_p3 = pnand %p2578_p1, %p2572_p9 }
  0x5d   : > { %2582 = shalt.err (!%p2579_p3)
}
  0x5e   : > { %s2756_s22 = smov 128   ;;  %s2757_s10 = smov 8  }
  0x5f   : > { %2401 = dma.hbm_to_vmem [thread:$0]  (!%p2882_p6), %s3326_s3, 2048, %s400_s25, [#allocation6], %s2756_s22, %s2756_s22, %s2757_s10  }
  0x60   : > { %s2758_s14 = smov [#allocation10]   ;;  %s2583_s28 = scalar_lea.hbm %s3332_s9, 4096 }
  0x61   : > { %s437_s26 = sshll.u32 %s2758_s14, 4  ;;  %p2584_p1 = scmp.ne.s32.totalorder %s3332_s9, %s2583_s28  ;;  %s438_s26 = int_to_ptr.vmem [resolvable:$true] %s437_s26 }
  0x62   : > { %p2590_p12 = scmp.lt.u32.totalorder %s2583_s28, %s3332_s9 }
  0x63   : > { %p2586_p3 = pnand %p2584_p1, %p2898_p8 }
  0x65   : > { %p2587_p11 = pneg %p2586_p3 }
  0x67   : > { %p2592_p13 = pnand %p2590_p12, %p2587_p11 }
  0x69   : > { %2595 = shalt.err (!%p2592_p13)
}
  0x6a   : > { %s2596_s25 = scalar_lea.vmem %s438_s26, 4096  ;;  %p2604_p7 = scmp.lt.s32.totalorder %s438_s26, %s438_s26 }
  0x6b   : > { %p2597_p0 = scmp.ne.s32.totalorder %s438_s26, %s2596_s25  ;;  %p2605_p9 = scmp.lt.s32.totalorder %s2596_s25, %s2596_s25 }
  0x6d   : > { %p2599_p2 = pnand %p2597_p0, %p2898_p8  ;;  %p2606_p4 = por %p2605_p9, %p2604_p7 }
  0x6f   : > { %p2600_p5 = pneg %p2599_p2 }
  0x71   : > { %p2607_p10 = pnand %p2606_p4, %p2600_p5 }
  0x73   : > { %2610 = shalt.err (!%p2607_p10)
}
  0x74   : > { %2407 = dma.hbm_to_vmem [thread:$0]  (!%p2882_p6), %s3332_s9, 4096, %s438_s26, [#allocation9], %s2756_s22, %s2756_s22, %s2757_s10  }
  0x75   : > { %s1991_s21 = sadd.s32 4294967294, %s2747_s16   ;;  %s2981_s23 = sadd.s32 1, %s2747_s16  }
  0x76   : > { %s40_s14 = ssub.s32 %s2747_s16, %s2981_s23  ;;  %s43_s12 = sadd.s32 1, %s2743_s15 }
  0x77   : > { %p41_p8 = scmp.eq.s32.totalorder %s40_s14, 0  ;;  %p50_p1 = scmp.ne.s32.totalorder %s2743_s15, %s2739_s30 }
  0x78   : > { %p51_p3 = scmp.eq.s32.totalorder %s2747_s16, 0  ;;  %p56_p11 = scmp.ne.s32.totalorder %s2739_s30, %s2735_s29 }
  0x79   : > { %s2992_s27 = scalar_select %p41_p8, %s2743_s15, %s43_s12  }
  0x7a   : > { %p2994_p12 = por %p51_p3, %p50_p1  ;;  %p3358_p13 = scmp.eq.s32.totalorder %s2866_s19, 0 }
  0x7b   : > { %p332_p0 = scmp.eq.s32.totalorder %s2866_s19, 1  ;;  %p338_p2 = scmp.eq.s32.totalorder %s1991_s21, 1 }
  0x7c   : > { %p3000_p6 = por %p3358_p13, %p56_p11  ;;  %p2423_p5 = scmp.lt.s32.totalorder %s2747_s16, 2 }
  0x7d   : > { %s460_s10 = sand.u32 1, %s2743_s15   ;;  %p3007_p7 = por %p332_p0, %p50_p1 }
  0x7e   : > { %p3011_p9 = por %p338_p2, %p56_p11  ;;  %s1998_s24 = sshll.u32 %s460_s10, 3 }
  0x7f   : > { %s3360_s26 = scalar_select %p3007_p7, 1, 0 }
  0x80   : > { %s3361_s17 = scalar_select %p3011_p9, 1, 0 }
  0x81   : > { %s1999_s13 = sshll.u32 %s2747_s16, 7  ;;  %s3362_s0 = sld [smem:[#allocation19_spill]] }
  0x82   : > { %s464_s11 = scalar_lea.vmem [#allocation2], %s1998_s24  ;;  %p3025_p4 = pnand %p2423_p5, %p2994_p12 }
  0x83   : > { %s471_s21 = sshll.u32 %s464_s11, 4  ;;  %s461_s12 = scalar_lea.sflag [#allocation3], %s460_s10  ;;  %s3021_s21 = int_to_ptr.vmem [resolvable:$true] %s471_s21 }
  0x84   : > { %p2613_p8 = pneg %p3025_p4 }
  0x87   : > { %s3019_s8 = scalar_lea.hbm %s3362_s0, %s1999_s13  ;;  %s2616_s18 = scalar_lea.hbm %s3362_s0, 256 }
  0x88   : > { %s2611_s1 = scalar_lea.hbm %s3019_s8, 128  ;;  %p2617_p11 = scmp.lt.u32.totalorder %s3019_s8, %s3362_s0 }
  0x89   : > { %p2612_p10 = scmp.ne.s32.totalorder %s3019_s8, %s2611_s1  ;;  %p2618_p12 = scmp.lt.u32.totalorder %s2616_s18, %s2611_s1 }
  0x8a   : > { %p2620_p0 = scmp.lt.u32.totalorder %s2611_s1, %s3019_s8 }
  0x8b   : > { %p2614_p1 = pnand %p2613_p8, %p2612_p10  ;;  %p2619_p13 = por %p2618_p12, %p2617_p11 }
  0x8d   : > { %p2615_p3 = pneg %p2614_p1  ;;  %p2621_p2 = por %p2620_p0, %p2619_p13 }
  0x8f   : > { %p2622_p5 = pnand %p2621_p2, %p2615_p3 }
  0x91   : > { %2625 = shalt.err (!%p2622_p5)
}
  0x92   : > { %s2626_s10 = scalar_lea.vmem %s3021_s21, 128  ;;  %s2759_s11 = smov [#allocation2]  }
  0x93   : > { %p2627_p10 = scmp.ne.s32.totalorder %s3021_s21, %s2626_s10  ;;  %s2631_s24 = sshll.u32 %s2759_s11, 4  ;;  %s2632_s24 = int_to_ptr.vmem [resolvable:$false] %s2631_s24 }
  0x94   : > { %s2633_s13 = scalar_lea.vmem %s2632_s24, 256  ;;  %p2634_p7 = scmp.lt.s32.totalorder %s3021_s21, %s2632_s24 }
  0x95   : > { %p2629_p1 = pnand %p2627_p10, %p2613_p8  ;;  %p2635_p11 = scmp.lt.s32.totalorder %s2633_s13, %s2626_s10 }
  0x97   : > { %p2630_p9 = pneg %p2629_p1  ;;  %p2636_p12 = por %p2635_p11, %p2634_p7 }
  0x99   : > { %p2637_p13 = pnand %p2636_p12, %p2630_p9 }
  0x9b   : > { %2640 = shalt.err (!%p2637_p13)
}
  0x9c   : > { %2411 = dma.hbm_to_vmem [thread:$0]  (!%p3025_p4), %s3019_s8, 128, %s3021_s21, %s461_s12  }
  0x9d   : > { %p3364_p3 = scmp.ne.s32.totalorder %s3353_s20, 0 }
  0x9e   : > { %s3057_s1 = sand.u32 (!%p3364_p3), 1, %s2739_s30  }
  0x9f   : > { %480 = sbr.rel (%p3364_p3) target bundleno = 4159 (0x103f), region = 72  ;;  %s3343_s18 = sshll.u32 (!%p3364_p3), %s3057_s1, 3 }
  0xa0   : > { %s483_s28 = scalar_lea.sflag (!%p3364_p3), [#allocation3], %s3057_s1  ;;  %s3063_s25 = scalar_lea.vmem (!%p3364_p3), [#allocation2], %s3343_s18 }
  0xa6   : > { %2714 = dma.done.wait (%p3000_p6), %s483_s28, 128  }
  0xa7   : > { %2716 = vsyncadd (%p3000_p6), %s483_s28, 4294967168  ;;  %p3365_p7 = scmp.eq.s32.totalorder %s2866_s19, 0 }
  0xa9   : > { %2718 = dma.done.wait (%p3365_p7), [#allocation6], 8192   ;;  %p3366_p9 = pmov %p3365_p7 }
  0xaa   : > { %p3367_p4 = pmov %p3365_p7 }
  0xab   : > { %2720 = vsyncadd (%p3366_p9), [#allocation6], 4294959104 }
  0xac   : > { %2722 = dma.done.wait (%p3367_p4), [#allocation9], 8192   ;;  %p3368_p8 = pmov %p3367_p4 }
  0xad   : > { %v2760_v0 = vmov 0.0   ;;  %v2761_v1 = vmov 0.0|0.0   ;;  %v554_v2 = vld [vmem:[#allocation5 + $0x8] sm:$0xff]  ;;  %v557_v3 = vld [vmem:[#allocation5 + $0x20] sm:$0xff]  ;;  %v556_v6 = vld [vmem:[#allocation5 + $0x18] sm:$0xff]  ;;  %vm2762_vm0 = vmmov 0  }
  0xae   : > { %2724 = vsyncadd (%p3368_p8), [#allocation9], 4294959104  ;;  %682 = vmatprep.mubr.f32.mxu0 %v2760_v0  ;;  %2261 = vmatprep.subr.bf16.mxu1 %v2761_v1  ;;  %v553_v4 = vld [vmem:[#allocation5] sm:$0xff]  ;;  %v2229_v5 = vpack.c.bf16 %v557_v3, %v554_v2  ;;  %v560_v7 = vld [vmem:[#allocation5 + $0x38] sm:$0xff]  ;;  %s3369_s2 = sld [smem:[#allocation21_spill]]  ;;  %vm760_vm1 = vcmask 261120  }
  0xaf   : > { %v563_v8 = vld [vmem:[#allocation5 + $0x50] sm:$0xff]  ;;  %v2231_v9 = vpack.c.bf16 %v556_v6, %v553_v4  ;;  %v562_v12 = vld [vmem:[#allocation5 + $0x48] sm:$0xff]  ;;  %v569_v14 = vld [vmem:[#allocation5 + $0x80] sm:$0xff]  ;;  %2151 = vmatprep.mubr.msk.f32.mxu1 %vm2762_vm0, %v2760_v0  ;;  %s2763_s8 = smov 96   ;;  %vm837_vm2 = vcmask 64512   ;;  %s2007_s21 = sshll.u32 %s3057_s1, 5 }
  0xb0   : > { %v2233_v10 = vpack.c.bf16 %v563_v8, %v560_v7  ;;  %v559_v11 = vld [vmem:[#allocation5 + $0x30] sm:$0xff]  ;;  %v566_v13 = vld [vmem:[#allocation5 + $0x68] sm:$0xff]  ;;  %2230 = vmatprep.subr.bf16.mxu0 %v2229_v5  ;;  %v565_v17 = vld [vmem:[#allocation5 + $0x60] sm:$0xff]  ;;  %s3133_s14 = scalar_lea.vmem [#allocation12], %s2007_s21  ;;  %s2764_s12 = smov 64   ;;  %vm1435_vm3 = vcmask 523264  }
  0xb1   : > { %2232 = vmatpush1.bf16.msra.mxu0 %v2231_v9  ;;  %v2235_v15 = vpack.c.bf16 %v562_v12, %v559_v11  ;;  %v2237_v16 = vpack.c.bf16 %v569_v14, %v566_v13  ;;  %v568_v18 = vld [vmem:[#allocation5 + $0x78] sm:$0xff]  ;;  %v575_v20 = vld [vmem:[#allocation5 + $0xb0] sm:$0xff]  ;;  %v574_v24 = vld [vmem:[#allocation5 + $0xa8] sm:$0xff]  ;;  %v603_v13 = vlaneseq  ;;  %s2765_s10 = smov 32   ;;  %vm1437_vm4 = vcmask 785408   ;;  %s3370_s21 = sld [smem:[#allocation22_spill]] }
  0xb2   : > { %2234 = vmatprep.subr.bf16.mxu0 %v2233_v10  ;;  %v572_v19 = vld [vmem:[#allocation5 + $0x98] sm:$0xff]  ;;  %v2239_v21 = vpack.c.bf16 %v568_v18, %v565_v17  ;;  %v571_v23 = vld [vmem:[#allocation5 + $0x90] sm:$0xff]  ;;  %v578_v25 = vld [vmem:[#allocation5 + $0xc8] sm:$0xff]  ;;  %s3371_s11 = sld [smem:[#allocation23_spill]]  ;;  %s2033_s24 = sshll.u32 %s2866_s19, 9 }
  0xb3   : > { %v2241_v22 = vpack.c.bf16 %v575_v20, %v572_v19  ;;  %v581_v26 = vld [vmem:[#allocation5 + $0xe0] sm:$0xff]  ;;  %v555_v27 = vld [vmem:[#allocation5 + $0x10] sm:$0xff]  ;;  %v558_v28 = vld [vmem:[#allocation5 + $0x28] sm:$0xff]  ;;  %v2243_v30 = vpack.c.bf16 %v574_v24, %v571_v23  ;;  %v3099_v14 = vshrl.u32 %v603_v13, 7  ;;  %s1848_s13 = sshll.u32 %s3133_s14, 4  ;;  %s3372_s20 = sld [smem:[#allocation27_spill]]  ;;  %s3240_s13 = int_to_ptr.vmem [resolvable:$true] %s1848_s13 }
  0xb4   : > { %v561_v29 = vld [vmem:[#allocation5 + $0x40] sm:$0xff]  ;;  %v2262_v31 = vpack.c.bf16 %v558_v28, %v555_v27  ;;  %v564_v32 = vld [vmem:[#allocation5 + $0x58] sm:$0xff]  ;;  %v2245_v33 = vpack.c.bf16 %v581_v26, %v578_v25  ;;  %v587_v37 = vld [vmem:[#allocation5 + $0x110] sm:$0xff]  ;;  %p3373_p0 = scmp.ne.s32.totalorder %s3360_s26, 0 }
  0xb5   : > { %2236 = vmatpush1.bf16.msra.mxu0 %v2235_v15  ;;  %v577_v34 = vld [vmem:[#allocation5 + $0xc0] sm:$0xff]  ;;  %v580_v35 = vld [vmem:[#allocation5 + $0xd8] sm:$0xff]  ;;  %v2265_v38 = vpack.c.bf16 %v564_v32, %v561_v29  ;;  %v567_v39 = vld [vmem:[#allocation5 + $0x70] sm:$0xff]  ;;  %v605_v15 = vsub.s32 0, %v3099_v14  ;;  %v609_v17 = vsub.s32 1, %v3099_v14  ;;  %v613_v25 = vsub.s32 2, %v3099_v14 }
  0xb6   : > { %2238 = vmatprep.subr.bf16.mxu0 %v2237_v16  ;;  %v584_v36 = vld [vmem:[#allocation5 + $0xf8] sm:$0xff]  ;;  %2263 = vmatpush3.bf16.msra.mxu1 %v2262_v31  ;;  %v570_v40 = vld [vmem:[#allocation5 + $0x88] sm:$0xff]  ;;  %v2247_v41 = vpack.c.bf16 %v580_v35, %v577_v34  ;;  %v583_v43 = vld [vmem:[#allocation5 + $0xf0] sm:$0xff] }
  0xb7   : > { %2264 = vmatprep.subr.bf16.mxu1 %v2761_v1  ;;  %v2249_v42 = vpack.c.bf16 %v587_v37, %v584_v36  ;;  %v586_v44 = vld [vmem:[#allocation5 + $0x108] sm:$0xff]  ;;  %v593_v46 = vld [vmem:[#allocation5 + $0x140] sm:$0xff]  ;;  %v2268_v47 = vpack.c.bf16 %v570_v40, %v567_v39  ;;  %v576_v49 = vld [vmem:[#allocation5 + $0xb8] sm:$0xff] }
  0xb8   : > { %v590_v45 = vld [vmem:[#allocation5 + $0x128] sm:$0xff]  ;;  %v573_v48 = vld [vmem:[#allocation5 + $0xa0] sm:$0xff]  ;;  %v2251_v50 = vpack.c.bf16 %v586_v44, %v583_v43  ;;  %v592_v53 = vld [vmem:[#allocation5 + $0x138] sm:$0xff] }
  0xb9   : > { %2240 = vmatpush1.bf16.msra.mxu0 %v2239_v21  ;;  %v2253_v51 = vpack.c.bf16 %v593_v46, %v590_v45  ;;  %v589_v52 = vld [vmem:[#allocation5 + $0x120] sm:$0xff]  ;;  %v596_v54 = vld [vmem:[#allocation5 + $0x158] sm:$0xff]  ;;  %v599_v55 = vld [vmem:[#allocation5 + $0x170] sm:$0xff]  ;;  %v2271_v56 = vpack.c.bf16 %v576_v49, %v573_v48  ;;  %s3238_s22 = scalar_lea.hbm %s3372_s20, %s2033_s24 }
  0xba   : > { %2242 = vmatprep.subr.bf16.mxu0 %v2241_v22  ;;  %2266 = vmatpush3.bf16.msra.mxu1 %v2265_v38  ;;  %v579_v57 = vld [vmem:[#allocation5 + $0xd0] sm:$0xff]  ;;  %v582_v58 = vld [vmem:[#allocation5 + $0xe8] sm:$0xff]  ;;  %v2255_v59 = vpack.c.bf16 %v592_v53, %v589_v52  ;;  %v2257_v60 = vpack.c.bf16 %v599_v55, %v596_v54  ;;  %v585_v2 = vld [vmem:[#allocation5 + $0x100] sm:$0xff] }
  0xbb   : > { %2267 = vmatprep.subr.bf16.mxu1 %v2761_v1  ;;  %v595_v61 = vld [vmem:[#allocation5 + $0x150] sm:$0xff]  ;;  %v598_v62 = vld [vmem:[#allocation5 + $0x168] sm:$0xff]  ;;  %v2274_v63 = vpack.c.bf16 %v582_v58, %v579_v57  ;;  %v588_v3 = vld [vmem:[#allocation5 + $0x118] sm:$0xff] }
  0xbc   : > { %v2259_v4 = vpack.c.bf16 %v598_v62, %v595_v61  ;;  %v2277_v5 = vpack.c.bf16 %v588_v3, %v585_v2  ;;  %v591_v6 = vld [vmem:[#allocation5 + $0x130] sm:$0xff]  ;;  %v594_v7 = vld [vmem:[#allocation5 + $0x148] sm:$0xff]  ;;  %v597_v10 = vld [vmem:[#allocation5 + $0x160] sm:$0xff] }
  0xbd   : > { %2244 = vmatpush1.bf16.msra.mxu0 %v2243_v30  ;;  %v3085_v8 = vld [vmem:[%s3063_s25] sm:$0xff]  ;;  %v2280_v9 = vpack.c.bf16 %v594_v7, %v591_v6 }
  0xbe   : > { %2246 = vmatprep.subr.bf16.mxu0 %v2245_v33  ;;  %2269 = vmatpush3.bf16.msra.mxu1 %v2268_v47  ;;  %v600_v11 = vld [vmem:[#allocation5 + $0x178] sm:$0xff]  ;;  %v601_v16 = vld [vmem:[%s3369_s2] sm:$0x7] }
  0xbf   : > { %2270 = vmatprep.subr.bf16.mxu1 %v2761_v1  ;;  %v2283_v12 = vpack.c.bf16 %v600_v11, %v597_v10  ;;  %v606_v18 = vrot.slane %v601_v16, %v605_v15  ;;  %v610_v19 = vrot.slane %v601_v16, %v609_v17  ;;  %v614_v26 = vrot.slane %v601_v16, %v613_v25 }
  0xc1   : > { %2248 = vmatpush1.bf16.msra.mxu0 %v2247_v41 }
  0xc2   : > { %2250 = vmatprep.subr.bf16.mxu0 %v2249_v42  ;;  %2272 = vmatpush3.bf16.msra.mxu1 %v2271_v56 }
  0xc3   : > { %2273 = vmatprep.subr.bf16.mxu1 %v2761_v1 }
  0xc5   : > { %2252 = vmatpush1.bf16.msra.mxu0 %v2251_v50 }
  0xc6   : > { %2254 = vmatprep.subr.bf16.mxu0 %v2253_v51  ;;  %2275 = vmatpush3.bf16.msra.mxu1 %v2274_v63 }
  0xc7   : > { %2276 = vmatprep.subr.bf16.mxu1 %v2761_v1 }
  0xc9   : > { %2256 = vmatpush1.bf16.msra.mxu0 %v2255_v59 }
  0xca   : > { %2258 = vmatprep.subr.bf16.mxu0 %v2257_v60  ;;  %2278 = vmatpush3.bf16.msra.mxu1 %v2277_v5 }
  0xcb   : > { %2279 = vmatprep.subr.bf16.mxu1 %v2761_v1 }
  0xcd   : > { %2260 = vmatpush1.bf16.msra.mxu0 %v2259_v4 }
  0xce   : > { %2285 = vmatprep.subr.bf16.mxu0 %v2761_v1  ;;  %2281 = vmatpush3.bf16.msra.mxu1 %v2280_v9 }
  0xcf   : > { %2282 = vmatprep.subr.bf16.mxu1 %v2761_v1 }
  0xd0   : > { %683 = vmatmul.mubr.f32.vlgmr.msra.gmra.mrb[0].mxu0 %v3085_v8 }
  0xd1   : > { %2226 = vmatprep.mubr.msk.f32.mxu0 %vm2762_vm0, %v2760_v0 }
  0xd2   : > { %2284 = vmatpush3.bf16.msra.mxu1 %v2283_v12 }
  0xd3   : > { %2154 = vmatprep.subr.mxu1 %v2760_v0 }
  0xd5   : > { %2152 = vmatmul.mubr.f32.vlgmr.msra.gmra.mrb[0].mxu1 %v3085_v8 }
  0xd6   : > { %2156 = vmatprep.mubr.msk.f32.mxu1 %vm2762_vm0, %v2760_v0 }
 0x1a3   : > { %v684_v20 = vpop.f32.mrb[0].mxu0 }
 0x1a4   : > { %v685_v21 = vadd.f32 %v684_v20, %v606_v18  ;;  %v686_v22 = vpop.f32.mrb[1].mxu0 }
 0x1a5   : > { %v3110_v23 = vadd.f32 %v686_v22, %v610_v19 }
 0x1a6   : > { %v3116_v24 = vmul.f32 0.17677669, %v685_v21 }
 0x1a7   : > { %924 = vrot.lane.b32.xlu1 %v3110_v23, %s2763_s8  ;;  %2155 = vmatpush3.xpose.msk.msra.mxu1 %vm760_vm1, %v3110_v23 }
 0x1a8   : > { %2159 = vmatprep.subr.mxu1 %v2760_v0  ;;  %v755_v27 = vpop.f32.mrb[0].mxu1 }
 0x1a9   : > { %v3126_v28 = vadd.f32 %v755_v27, %v614_v26  ;;  %v2153_v29 = vpop.f32.mrb[1].mxu1 }
 0x1aa   : > { %2157 = vmatmul.mubr.msk.f32.vlgmr.msra.gmra.mrb[2].mxu1 %vm760_vm1, %v3116_v24 }
 0x1ab   : > { %922 = vrot.lane.b32.xlu1 %v3116_v24, %s2763_s8  ;;  %2161 = vmatprep.mubr.msk.f32.mxu1 %vm2762_vm0, %v2760_v0 }
 0x1ac   : > { %2160 = vmatpush3.msra.mxu1 %v3126_v28 }
 0x1ad   : > { %2164 = vmatprep.subr.mxu1 %v2760_v0 }
 0x219   : > { %v925_v40 = vpop.permute.xlu1 %924 }
 0x21d   : > { %v923_v42 = vpop.permute.xlu1 %922 }
 0x27d   : > { %v833_v30 = vpop.f32.mrb[2].mxu1 }
 0x27e   : > { %v2158_v31 = vpop.f32.mrb[3].mxu1  ;;  %v838_v32 = vsel %vm837_vm2, %v833_v30, -inf }
 0x27f   : > { %839 = vmax.xlane.f32.xlu0 %v838_v32  ;;  %v1440_v32 = vld [vmem:[#allocation7 + $0x8] sm:$0xff] }
 0x30c   : > { %v840_v33 = vpop.xlane.xlu0 %839 }
 0x30d   : > { %v841_v34 = vsub.f32 %v833_v30, %v840_v33  ;;  %v1441_v33 = vld [vmem:[#allocation7 + $0x10] sm:$0xff] }
 0x30f   : > { %v842_v35 = vmul.f32 1.442695, %v841_v34 }
 0x311   : > { %2479 = vpow2.f32 %v842_v35  ;;  %v1442_v35 = vld [vmem:[#allocation7 + $0x18] sm:$0xff] }
 0x31b   : > { %v2480_v36 = vpop.eup %2479 }
 0x31c   : > { %v844_v37 = vsel %vm837_vm2, %v2480_v36, 0.0 }
 0x31d   : > { %845 = vadd.xlane.f32.xlu0 %v844_v37  ;;  %v1443_v37 = vld [vmem:[#allocation7 + $0x20] sm:$0xff] }
 0x3aa   : > { %v846_v38 = vpop.xlane.xlu0 %845 }
 0x3ab   : > { %2481 = vrcp.f32 %v846_v38  ;;  %v1444_v38 = vld [vmem:[#allocation7 + $0x28] sm:$0xff] }
 0x3b5   : > { %v2482_v39 = vpop.eup %2481 }
 0x3b6   : > { %v848_v41 = vmul.f32 %v2482_v39, %v2480_v36  ;;  %v2289_v36 = vpack.c.bf16 %v1442_v35, %v1441_v33  ;;  %v2292_v39 = vpack.c.bf16 %v1444_v38, %v1443_v37  ;;  %v1575_v33 = vld [vmem:[#allocation8 + $0x70] sm:$0xff]  ;;  %v1578_v35 = vld [vmem:[#allocation8 + $0x88] sm:$0xff]  ;;  %v1577_v38 = vld [vmem:[#allocation8 + $0x80] sm:$0xff] }
 0x3b8   : > { %1418 = vst.msk [vmem:[%s3133_s14] sm:$0xff] %vm837_vm2, %v848_v41  ;;  %2162 = vmatmul.mubr.msk.f32.vlgmr.msra.gmra.mrb[4].mxu1 %vm837_vm2, %v848_v41  ;;  %v1446_v41 = vld [vmem:[#allocation7 + $0x38] sm:$0xff] }
 0x3b9   : > { %2165 = vmatpush3.xpose.msk.msra.mxu1 %vm760_vm1, %v925_v40  ;;  %2166 = vmatprep.mubr.msk.f32.mxu1 %vm2762_vm0, %v2760_v0  ;;  %v1445_v40 = vld [vmem:[#allocation7 + $0x30] sm:$0xff] }
 0x3ba   : > { %2169 = vmatprep.subr.mxu1 %v2760_v0 }
 0x3bc   : > { %2167 = vmatmul.mubr.msk.f32.vlgmr.msra.gmra.mrb[6].mxu1 %vm760_vm1, %v923_v42  ;;  %v2295_v42 = vpack.c.bf16 %v1446_v41, %v1445_v40  ;;  %v1582_v41 = vld [vmem:[#allocation8 + $0xa8] sm:$0xff] }
 0x3bd   : > { %2171 = vmatprep.mubr.msk.f32.mxu1 %vm2762_vm0, %v2760_v0 }
 0x48b   : > { %v3145_v43 = vpop.f32.mrb[4].mxu1 }
 0x48c   : > { %v2163_v44 = vpop.f32.mrb[5].mxu1 }
 0x48d   : > { %v1448_v44 = vld [vmem:[#allocation7 + $0x48] sm:$0xff] }
 0x48f   : > { %v996_v45 = vpop.f32.mrb[6].mxu1 }
 0x490   : > { %v2168_v46 = vpop.f32.mrb[7].mxu1  ;;  %v1000_v47 = vsel %vm837_vm2, %v996_v45, -inf }
 0x491   : > { %1001 = vmax.xlane.f32.xlu0 %v1000_v47  ;;  %v1449_v46 = vld [vmem:[#allocation7 + $0x50] sm:$0xff]  ;;  %v1450_v47 = vld [vmem:[#allocation7 + $0x58] sm:$0xff] }
 0x4a7   : > { %1012 = vrot.lane.b32.xlu0 %v3126_v28, %s2763_s8 }
 0x4ab   : > { %1090 = vrot.lane.b32.xlu0 %v3110_v23, %s2764_s12 }
 0x4af   : > { %1088 = vrot.lane.b32.xlu0 %v3116_v24, %s2764_s12 }
 0x51e   : > { %v1002_v48 = vpop.xlane.xlu0 %1001 }
 0x51f   : > { %v1003_v49 = vsub.f32 %v996_v45, %v1002_v48  ;;  %v2301_v48 = vpack.c.bf16 %v1450_v47, %v1449_v46  ;;  %v1586_v47 = vld [vmem:[#allocation8 + $0xc8] sm:$0xff] }
 0x521   : > { %v1004_v50 = vmul.f32 1.442695, %v1003_v49  ;;  %v1451_v49 = vld [vmem:[#allocation7 + $0x60] sm:$0xff] }
 0x522   : > { %v1013_v51 = vpop.permute.xlu0 %1012 }
 0x523   : > { %2483 = vpow2.f32 %v1004_v50  ;;  %2170 = vmatpush3.msra.mxu1 %v1013_v51  ;;  %v1452_v50 = vld [vmem:[#allocation7 + $0x68] sm:$0xff] }
 0x524   : > { %2174 = vmatprep.subr.mxu1 %v2760_v0  ;;  %v2304_v51 = vpack.c.bf16 %v1452_v50, %v1451_v49  ;;  %v1585_v50 = vld [vmem:[#allocation8 + $0xc0] sm:$0xff] }
 0x526   : > { %v1091_v56 = vpop.permute.xlu0 %1090 }
 0x52a   : > { %v1089_v58 = vpop.permute.xlu0 %1088 }
 0x52d   : > { %v2484_v52 = vpop.eup %2483 }
 0x52e   : > { %v1006_v53 = vsel %vm837_vm2, %v2484_v52, 0.0 }
 0x52f   : > { %1007 = vadd.xlane.f32.xlu1 %v1006_v53  ;;  %v1454_v53 = vld [vmem:[#allocation7 + $0x78] sm:$0xff] }
 0x540   : > { %1177 = vrot.lane.b32.xlu1 %v3126_v28, %s2764_s12 }
 0x544   : > { %1255 = vrot.lane.b32.xlu1 %v3110_v23, %s2765_s10 }
 0x5bc   : > { %v1008_v54 = vpop.xlane.xlu1 %1007 }
 0x5bd   : > { %2485 = vrcp.f32 %v1008_v54 }
 0x5c0   : > { %v1178_v59 = vpop.permute.xlu1 %1177 }
 0x5c4   : > { %v1256_v9 = vpop.permute.xlu1 %1255 }
 0x5c7   : > { %v2486_v55 = vpop.eup %2485 }
 0x5c8   : > { %v1010_v57 = vmul.f32 %v2486_v55, %v2484_v52  ;;  %v1453_v52 = vld [vmem:[#allocation7 + $0x70] sm:$0xff] }
 0x5c9   : > { %v2307_v54 = vpack.c.bf16 %v1454_v53, %v1453_v52  ;;  %v1590_v53 = vld [vmem:[#allocation8 + $0xe8] sm:$0xff] }
 0x5ca   : > { %1419 = vst.msk [vmem:[%s3133_s14 + $0x8] sm:$0xff] %vm837_vm2, %v1010_v57  ;;  %2172 = vmatmul.mubr.msk.f32.vlgmr.msra.gmra.mrb[8].mxu1 %vm837_vm2, %v1010_v57 }
 0x5cb   : > { %2175 = vmatpush3.xpose.msk.msra.mxu1 %vm760_vm1, %v1091_v56  ;;  %2176 = vmatprep.mubr.msk.f32.mxu1 %vm2762_vm0, %v2760_v0 }
 0x5cc   : > { %2179 = vmatprep.subr.mxu1 %v2760_v0 }
 0x5ce   : > { %2177 = vmatmul.mubr.msk.f32.vlgmr.msra.gmra.mrb[10].mxu1 %vm760_vm1, %v1089_v58 }
 0x5cf   : > { %2180 = vmatpush3.msra.mxu1 %v1178_v59  ;;  %2181 = vmatprep.mubr.msk.f32.mxu1 %vm2762_vm0, %v2760_v0 }
 0x5d0   : > { %2184 = vmatprep.subr.mxu1 %v2760_v0 }
 0x69d   : > { %v1084_v60 = vpop.f32.mrb[8].mxu1 }
 0x69e   : > { %v2173_v61 = vpop.f32.mrb[9].mxu1 }
 0x6a1   : > { %v1162_v62 = vpop.f32.mrb[10].mxu1 }
 0x6a2   : > { %v2178_v63 = vpop.f32.mrb[11].mxu1  ;;  %v1166_v2 = vsel %vm837_vm2, %v1162_v62, -inf }
 0x6a3   : > { %1167 = vmax.xlane.f32.xlu0 %v1166_v2 }
 0x730   : > { %v1168_v3 = vpop.xlane.xlu0 %1167 }
 0x731   : > { %v1169_v4 = vsub.f32 %v1162_v62, %v1168_v3 }
 0x733   : > { %v1170_v5 = vmul.f32 1.442695, %v1169_v4  ;;  %v1562_v4 = vld [vmem:[#allocation8 + $0x8] sm:$0xff] }
 0x735   : > { %2487 = vpow2.f32 %v1170_v5  ;;  %v1564_v5 = vld [vmem:[#allocation8 + $0x18] sm:$0xff] }
 0x73f   : > { %v2488_v6 = vpop.eup %2487 }
 0x740   : > { %v1172_v7 = vsel %vm837_vm2, %v2488_v6, 0.0 }
 0x741   : > { %1173 = vadd.xlane.f32.xlu1 %v1172_v7  ;;  %v2309_v7 = vpack.c.bf16 %v1564_v5, %v1562_v4  ;;  %v1680_v5 = vld [vmem:[#allocation10 + $0x10] sm:$0xff] }
 0x752   : > { %1253 = vrot.lane.b32.xlu1 %v3116_v24, %s2765_s10 }
 0x7ce   : > { %v1174_v10 = vpop.xlane.xlu1 %1173 }
 0x7cf   : > { %2489 = vrcp.f32 %v1174_v10  ;;  %v1566_v10 = vld [vmem:[#allocation8 + $0x28] sm:$0xff] }
 0x7d2   : > { %v1254_v13 = vpop.permute.xlu1 %1253 }
 0x7d9   : > { %v2490_v11 = vpop.eup %2489 }
 0x7da   : > { %v1176_v12 = vmul.f32 %v2490_v11, %v2488_v6  ;;  %v1561_v6 = vld [vmem:[#allocation8] sm:$0xff]  ;;  %v1568_v11 = vld [vmem:[#allocation8 + $0x38] sm:$0xff] }
 0x7dc   : > { %1420 = vst.msk [vmem:[%s3133_s14 + $0x10] sm:$0xff] %vm837_vm2, %v1176_v12  ;;  %2182 = vmatmul.mubr.msk.f32.vlgmr.msra.gmra.mrb[12].mxu1 %vm837_vm2, %v1176_v12  ;;  %v2313_v12 = vpack.c.bf16 %v1568_v11, %v1566_v10 }
 0x7dd   : > { %2185 = vmatpush3.xpose.msk.msra.mxu1 %vm760_vm1, %v1256_v9  ;;  %2186 = vmatprep.mubr.msk.f32.mxu1 %vm2762_vm0, %v2760_v0  ;;  %v1563_v9 = vld [vmem:[#allocation8 + $0x10] sm:$0xff] }
 0x7de   : > { %2189 = vmatprep.subr.mxu1 %v2760_v0 }
 0x7e0   : > { %2187 = vmatmul.mubr.msk.f32.vlgmr.msra.gmra.mrb[14].mxu1 %vm760_vm1, %v1254_v13  ;;  %v1565_v13 = vld [vmem:[#allocation8 + $0x20] sm:$0xff] }
 0x7e1   : > { %2191 = vmatprep.mubr.msk.f32.mxu1 %vm2762_vm0, %v2760_v0 }
 0x8af   : > { %v1249_v16 = vpop.f32.mrb[12].mxu1 }
 0x8b0   : > { %v2183_v18 = vpop.f32.mrb[13].mxu1 }
 0x8b1   : > { %v1570_v18 = vld [vmem:[#allocation8 + $0x48] sm:$0xff] }
 0x8b3   : > { %v1327_v19 = vpop.f32.mrb[14].mxu1 }
 0x8b4   : > { %v2188_v20 = vpop.f32.mrb[15].mxu1  ;;  %v1331_v21 = vsel %vm837_vm2, %v1327_v19, -inf }
 0x8b5   : > { %1332 = vmax.xlane.f32.xlu0 %v1331_v21 }
 0x8cb   : > { %1342 = vrot.lane.b32.xlu0 %v3126_v28, %s2765_s10  ;;  %v1439_v28 = vld [vmem:[#allocation7] sm:$0xff] }
 0x8cc   : > { %v2286_v34 = vpack.c.bf16 %v1440_v32, %v1439_v28  ;;  %v1573_v32 = vld [vmem:[#allocation8 + $0x60] sm:$0xff] }
 0x8ce   : > { %2287 = vmatpush3.bf16.msra.mxu0 %v2286_v34  ;;  %v2323_v34 = vpack.c.bf16 %v1575_v33, %v1573_v32  ;;  %v1688_v33 = vld [vmem:[#allocation10 + $0x50] sm:$0xff] }
 0x8cf   : > { %1423 = vrot.lane.b32.xlu0 %v1084_v60, %s2765_s10  ;;  %2288 = vmatprep.subr.bf16.mxu0 %v2761_v1 }
 0x8d2   : > { %2290 = vmatpush3.bf16.msra.mxu0 %v2289_v36  ;;  %v1580_v36 = vld [vmem:[#allocation8 + $0x98] sm:$0xff] }
 0x8d3   : > { %1427 = vrot.lane.b32.xlu0 %v1249_v16, %s2764_s12  ;;  %2291 = vmatprep.subr.bf16.mxu0 %v2761_v1  ;;  %v1567_v16 = vld [vmem:[#allocation8 + $0x30] sm:$0xff]  ;;  %v2325_v37 = vpack.c.bf16 %v1580_v36, %v1578_v35  ;;  %v1706_v35 = vld [vmem:[#allocation10 + $0xe0] sm:$0xff]  ;;  %v1707_v36 = vld [vmem:[#allocation10 + $0xe8] sm:$0xff]  ;;  %s2766_s12 = smov [#allocation12]  }
 0x8d4   : > { %v2315_v20 = vpack.c.bf16 %v1567_v16, %v1565_v13  ;;  %v1700_v13 = vld [vmem:[#allocation10 + $0xb0] sm:$0xff]  ;;  %v1701_v16 = vld [vmem:[#allocation10 + $0xb8] sm:$0xff]  ;;  %s2645_s10 = sshll.u32 %s2766_s12, 4  ;;  %s2646_s10 = int_to_ptr.vmem [resolvable:$false] %s2645_s10 }
 0x8d5   : > { %p2648_p10 = scmp.lt.s32.totalorder %s3240_s13, %s2646_s10 }
 0x8d6   : > { %2293 = vmatpush3.bf16.msra.mxu0 %v2292_v39  ;;  %v1579_v39 = vld [vmem:[#allocation8 + $0x90] sm:$0xff] }
 0x8d7   : > { %2294 = vmatprep.subr.bf16.mxu0 %v2761_v1  ;;  %v2327_v40 = vpack.c.bf16 %v1579_v39, %v1577_v38  ;;  %v2365_v38 = vpack.c.bf16 %v1707_v36, %v1706_v35 }
 0x8da   : > { %2296 = vmatpush3.bf16.msra.mxu0 %v2295_v42  ;;  %v1584_v42 = vld [vmem:[#allocation8 + $0xb8] sm:$0xff] }
 0x8db   : > { %2297 = vmatprep.subr.bf16.mxu0 %v2761_v1 }
 0x942   : > { %v1333_v22 = vpop.xlane.xlu0 %1332 }
 0x943   : > { %v1334_v23 = vsub.f32 %v1327_v19, %v1333_v22  ;;  %v1572_v19 = vld [vmem:[#allocation8 + $0x58] sm:$0xff] }
 0x944   : > { %v2317_v21 = vpack.c.bf16 %v1572_v19, %v1570_v18  ;;  %v2353_v19 = vpack.c.bf16 %v1701_v16, %v1700_v13 }
 0x945   : > { %v1335_v24 = vmul.f32 1.442695, %v1334_v23 }
 0x946   : > { %v1343_v25 = vpop.permute.xlu0 %1342 }
 0x947   : > { %2491 = vpow2.f32 %v1335_v24  ;;  %2190 = vmatpush3.msra.mxu1 %v1343_v25 }
 0x948   : > { %2310 = vmatprep.subr.bf16.mxu1 %v2309_v7  ;;  %v1698_v7 = vld [vmem:[#allocation10 + $0xa0] sm:$0xff] }
 0x94a   : > { %v1424_v57 = vpop.permute.xlu0 %1423 }
 0x94b   : > { %v1434_v59 = vsel %vm760_vm1, %v3145_v43, %v1424_v57  ;;  %v2311_v43 = vpack.c.bf16 %v1563_v9, %v1561_v6  ;;  %v1591_v57 = vld [vmem:[#allocation8 + $0xf0] sm:$0xff]  ;;  %v1681_v6 = vld [vmem:[#allocation10 + $0x18] sm:$0xff]  ;;  %v1699_v9 = vld [vmem:[#allocation10 + $0xa8] sm:$0xff] }
 0x94c   : > { %v2347_v10 = vpack.c.bf16 %v1681_v6, %v1680_v5  ;;  %v2349_v11 = vpack.c.bf16 %v1699_v9, %v1698_v7 }
 0x94e   : > { %v1428_v58 = vpop.permute.xlu0 %1427 }
 0x94f   : > { %v1436_v60 = vsel %vm1435_vm3, %v1434_v59, %v1428_v58  ;;  %v1694_v59 = vld [vmem:[#allocation10 + $0x80] sm:$0xff] }
 0x951   : > { %v2492_v26 = vpop.eup %2491 }
 0x952   : > { %v1337_v27 = vsel %vm837_vm2, %v2492_v26, 0.0 }
 0x953   : > { %1338 = vadd.xlane.f32.xlu1 %v1337_v27  ;;  %v1571_v27 = vld [vmem:[#allocation8 + $0x50] sm:$0xff] }
 0x9e0   : > { %v1339_v29 = vpop.xlane.xlu1 %1338 }
 0x9e1   : > { %2493 = vrcp.f32 %v1339_v29 }
 0x9eb   : > { %v2494_v30 = vpop.eup %2493 }
 0x9ec   : > { %v1341_v31 = vmul.f32 %v2494_v30, %v2492_v26  ;;  %v1569_v26 = vld [vmem:[#allocation8 + $0x40] sm:$0xff]  ;;  %v1574_v30 = vld [vmem:[#allocation8 + $0x68] sm:$0xff] }
 0x9ed   : > { %v2319_v29 = vpack.c.bf16 %v1571_v27, %v1569_v26  ;;  %v1686_v27 = vld [vmem:[#allocation10 + $0x40] sm:$0xff] }
 0x9ee   : > { %1421 = vst.msk [vmem:[%s3133_s14 + $0x18] sm:$0xff] %vm837_vm2, %v1341_v31  ;;  %2192 = vmatmul.mubr.msk.f32.vlgmr.msra.gmra.mrb[16].mxu1 %vm837_vm2, %v1341_v31  ;;  %v1576_v31 = vld [vmem:[#allocation8 + $0x78] sm:$0xff]  ;;  %s2647_s14 = scalar_lea.vmem %s2646_s10, 1024 }
 0x9ef   : > { %1669 = vmatprep.mubr.f32.mxu1 %v2760_v0  ;;  %v1447_v0 = vld [vmem:[#allocation7 + $0x40] sm:$0xff]  ;;  %2312 = vmatpush1.bf16.msra.mxu1 %v2311_v43  ;;  %v2321_v28 = vpack.c.bf16 %v1576_v31, %v1574_v30  ;;  %v1704_v30 = vld [vmem:[#allocation10 + $0xd0] sm:$0xff]  ;;  %v1705_v31 = vld [vmem:[#allocation10 + $0xd8] sm:$0xff] }
 0x9f0   : > { %v2298_v45 = vpack.c.bf16 %v1448_v44, %v1447_v0  ;;  %2314 = vmatprep.subr.bf16.mxu1 %v2313_v12  ;;  %v2329_v0 = vpack.c.bf16 %v1584_v42, %v1582_v41  ;;  %v1581_v44 = vld [vmem:[#allocation8 + $0xa0] sm:$0xff]  ;;  %v1683_v12 = vld [vmem:[#allocation10 + $0x28] sm:$0xff]  ;;  %v2361_v32 = vpack.c.bf16 %v1705_v31, %v1704_v30 }
 0x9f1   : > { %v1682_v43 = vld [vmem:[#allocation10 + $0x20] sm:$0xff] }
 0x9f2   : > { %2299 = vmatpush3.bf16.msra.mxu0 %v2298_v45  ;;  %v1583_v45 = vld [vmem:[#allocation8 + $0xb0] sm:$0xff]  ;;  %v2351_v18 = vpack.c.bf16 %v1683_v12, %v1682_v43 }
 0x9f3   : > { %2300 = vmatprep.subr.bf16.mxu0 %v2761_v1  ;;  %2316 = vmatpush1.bf16.msra.mxu1 %v2315_v20  ;;  %v2331_v46 = vpack.c.bf16 %v1583_v45, %v1581_v44  ;;  %v1684_v20 = vld [vmem:[#allocation10 + $0x30] sm:$0xff] }
 0x9f4   : > { %2318 = vmatprep.subr.bf16.mxu1 %v2317_v21  ;;  %v1685_v21 = vld [vmem:[#allocation10 + $0x38] sm:$0xff]  ;;  %v2022_v45 = vld [vmem:[%s3329_s6] ss:$0 sm:$0xff] }
 0x9f6   : > { %2302 = vmatpush3.bf16.msra.mxu0 %v2301_v48  ;;  %v1588_v48 = vld [vmem:[#allocation8 + $0xd8] sm:$0xff] }
 0x9f7   : > { %2303 = vmatprep.subr.bf16.mxu0 %v2761_v1  ;;  %2320 = vmatpush1.bf16.msra.mxu1 %v2319_v29  ;;  %v2333_v49 = vpack.c.bf16 %v1588_v48, %v1586_v47  ;;  %v1687_v29 = vld [vmem:[#allocation10 + $0x48] sm:$0xff] }
 0x9f8   : > { %2322 = vmatprep.subr.bf16.mxu1 %v2321_v28  ;;  %v2359_v28 = vpack.c.bf16 %v1687_v29, %v1686_v27 }
 0x9fa   : > { %2305 = vmatpush3.bf16.msra.mxu0 %v2304_v51  ;;  %v1587_v51 = vld [vmem:[#allocation8 + $0xd0] sm:$0xff] }
 0x9fb   : > { %2306 = vmatprep.subr.bf16.mxu0 %v2761_v1  ;;  %v2020_v1 = vld [vmem:[%s3327_s4] ss:$0 sm:$0xff]  ;;  %2324 = vmatpush1.bf16.msra.mxu1 %v2323_v34  ;;  %v2335_v52 = vpack.c.bf16 %v1587_v51, %v1585_v50  ;;  %v1689_v34 = vld [vmem:[#allocation10 + $0x58] sm:$0xff]  ;;  %v1691_v50 = vld [vmem:[#allocation10 + $0x68] sm:$0xff] }
 0x9fc   : > { %2326 = vmatprep.subr.bf16.mxu1 %v2325_v37  ;;  %v2363_v37 = vpack.c.bf16 %v1689_v34, %v1688_v33 }
 0x9fe   : > { %2308 = vmatpush3.bf16.msra.mxu0 %v2307_v54  ;;  %v1592_v54 = vld [vmem:[#allocation8 + $0xf8] sm:$0xff] }
 0x9ff   : > { %2328 = vmatpush1.bf16.msra.mxu1 %v2327_v40 }
 0xa00   : > { %2330 = vmatprep.subr.bf16.mxu1 %v2329_v0  ;;  %v2021_v0 = vld [vmem:[%s3328_s5] ss:$0 sm:$0xff] }
 0xa03   : > { %2332 = vmatpush1.bf16.msra.mxu1 %v2331_v46 }
 0xa04   : > { %2334 = vmatprep.subr.bf16.mxu1 %v2333_v49  ;;  %v1690_v49 = vld [vmem:[#allocation10 + $0x60] sm:$0xff] }
 0xa05   : > { %v2367_v51 = vpack.c.bf16 %v1691_v50, %v1690_v49 }
 0xa07   : > { %2336 = vmatpush1.bf16.msra.mxu1 %v2335_v52  ;;  %v1708_v52 = vld [vmem:[#allocation10 + $0xf0] sm:$0xff] }
 0xac1   : > { %v1414_v55 = vpop.f32.mrb[16].mxu1 }
 0xac2   : > { %1431 = vrot.lane.b32.xlu0 %v1414_v55, %s2763_s8  ;;  %v2193_v56 = vpop.f32.mrb[17].mxu1  ;;  %v1589_v55 = vld [vmem:[#allocation8 + $0xe0] sm:$0xff]  ;;  %s1822_s8 = scalar_lea.sflag [#allocation13], %s3057_s1 }
 0xac3   : > { %v2337_v56 = vpack.c.bf16 %v1592_v54, %v1590_v53  ;;  %v2339_v58 = vpack.c.bf16 %v1591_v57, %v1589_v55  ;;  %v1709_v53 = vld [vmem:[#allocation10 + $0xf8] sm:$0xff]  ;;  %v1692_v55 = vld [vmem:[#allocation10 + $0x70] sm:$0xff] }
 0xac4   : > { %v2369_v54 = vpack.c.bf16 %v1709_v53, %v1708_v52  ;;  %v1593_v57 = vld [vmem:[%s3370_s21] sm:$0x3]  ;;  %s2641_s21 = scalar_lea.vmem %s3240_s13, 512 }
 0xac5   : > { %2338 = vmatprep.subr.bf16.mxu1 %v2337_v56  ;;  %p2642_p6 = scmp.ne.s32.totalorder %s3240_s13, %s2641_s21  ;;  %p2649_p1 = scmp.lt.s32.totalorder %s2647_s14, %s2641_s21 }
 0xac6   : > { %2340 = vmatpush1.bf16.msra.mxu1 %v2339_v58  ;;  %v1602_v58 = vrot.slane %v1593_v57, %v609_v17 }
 0xac7   : > { %p2643_p2 = pnand %p2642_p6, %p3373_p0  ;;  %p2650_p11 = por %p2649_p1, %p2648_p10 }
 0xac9   : > { %p2644_p5 = pneg %p2643_p2 }
 0xacb   : > { %p2651_p12 = pnand %p2650_p11, %p2644_p5 }
 0xb34   : > { %v1432_v61 = vpop.permute.xlu0 %1431 }
 0xb35   : > { %v1438_v62 = vsel %vm1437_vm4, %v1436_v60, %v1432_v61  ;;  %v1695_v60 = vld [vmem:[#allocation10 + $0x88] sm:$0xff]  ;;  %v1678_v61 = vld [vmem:[#allocation10] sm:$0xff] }
 0xb36   : > { %2227 = vmatmul.mubr.f32.vlgmr.msra.gmra.mrb[2].mxu0 %v1438_v62  ;;  %v2341_v62 = vpack.c.bf16 %v1695_v60, %v1694_v59 }
 0xb38   : > { %2342 = vmatprep.subr.bf16.mxu0 %v2341_v62 }
 0xc09   : > { %v1528_v63 = vpop.f32.mrb[2].mxu0 }
 0xc0a   : > { %v1529_v2 = vadd.f32 %v2020_v1, %v1528_v63  ;;  %v2228_v3 = vpop.f32.mrb[3].mxu0  ;;  %v1679_v1 = vld [vmem:[#allocation10 + $0x8] sm:$0xff]  ;;  %v1696_v63 = vld [vmem:[#allocation10 + $0x90] sm:$0xff] }
 0xc0b   : > { %v2343_v3 = vpack.c.bf16 %v1679_v1, %v1678_v61 }
 0xc0c   : > { %1534 = vadd.xlane.f32.xlu1 %v1529_v2 }
 0xc0d   : > { %2344 = vmatpush3.bf16.msra.mxu0 %v2343_v3 }
 0xc99   : > { %v1535_v22 = vpop.xlane.xlu1 %1534 }
 0xc9a   : > { %v1537_v23 = vmul.f32 0.0078125, %v1535_v22  ;;  %v1702_v22 = vld [vmem:[#allocation10 + $0xc0] sm:$0xff] }
 0xc9c   : > { %v3208_v24 = vsub.f32 %v1529_v2, %v1537_v23  ;;  %v1697_v2 = vld [vmem:[#allocation10 + $0x98] sm:$0xff]  ;;  %v1703_v23 = vld [vmem:[#allocation10 + $0xc8] sm:$0xff] }
 0xc9d   : > { %v2345_v4 = vpack.c.bf16 %v1697_v2, %v1696_v63  ;;  %v2357_v26 = vpack.c.bf16 %v1703_v23, %v1702_v22 }
 0xc9e   : > { %v1539_v25 = vmul.f32 %v3208_v24, %v3208_v24 }
 0xc9f   : > { %2346 = vmatprep.subr.bf16.mxu0 %v2345_v4 }
 0xca0   : > { %1540 = vadd.xlane.f32.xlu0 %v1539_v25  ;;  %2348 = vmatpush3.bf16.msra.mxu0 %v2347_v10  ;;  %v2355_v25 = vpack.c.bf16 %v1685_v21, %v1684_v20 }
 0xca1   : > { %2350 = vmatprep.subr.bf16.mxu0 %v2349_v11 }
 0xca4   : > { %2352 = vmatpush3.bf16.msra.mxu0 %v2351_v18 }
 0xca5   : > { %2354 = vmatprep.subr.bf16.mxu0 %v2353_v19 }
 0xca8   : > { %2356 = vmatpush3.bf16.msra.mxu0 %v2355_v25 }
 0xca9   : > { %2358 = vmatprep.subr.bf16.mxu0 %v2357_v26 }
 0xcac   : > { %2360 = vmatpush3.bf16.msra.mxu0 %v2359_v28 }
 0xcad   : > { %2362 = vmatprep.subr.bf16.mxu0 %v2361_v32 }
 0xcb0   : > { %2364 = vmatpush3.bf16.msra.mxu0 %v2363_v37 }
 0xcb1   : > { %2366 = vmatprep.subr.bf16.mxu0 %v2365_v38 }
 0xcb4   : > { %2368 = vmatpush3.bf16.msra.mxu0 %v2367_v51 }
 0xcb5   : > { %2370 = vmatprep.subr.bf16.mxu0 %v2369_v54 }
 0xd2d   : > { %v1541_v39 = vpop.xlane.xlu0 %1540 }
 0xd2e   : > { %v1542_v40 = vmul.f32 0.0078125, %v1541_v39 }
 0xd30   : > { %v1543_v41 = vadd.f32 1e-05, %v1542_v40 }
 0xd32   : > { %2495 = vrsqrt.f32 %v1543_v41 }
 0xd3c   : > { %v2496_v42 = vpop.eup %2495 }
 0xd3d   : > { %v1545_v44 = vmul.f32 %v2496_v42, %v3208_v24  ;;  %v1693_v24 = vld [vmem:[#allocation10 + $0x78] sm:$0xff] }
 0xd3e   : > { %v2371_v56 = vpack.c.bf16 %v1693_v24, %v1692_v55 }
 0xd3f   : > { %v1552_v46 = vmul.f32 %v2021_v0, %v1545_v44 }
 0xd40   : > { %2372 = vmatpush3.bf16.msra.mxu0 %v2371_v56 }
 0xd41   : > { %v1559_v47 = vadd.f32 %v2022_v45, %v1552_v46 }
 0xd43   : > { %v3220_v48 = vadd.f32 %v1559_v47, %v3085_v8  ;;  %v1598_v8 = vrot.slane %v1593_v57, %v605_v15  ;;  %v2023_v15 = vld [vmem:[%s3371_s11] ss:$0 sm:$0xff] }
 0xd45   : > { %1670 = vmatmul.mubr.f32.vlgmr.msra.gmra.mrb[18].mxu1 %v3220_v48 }
 0xe18   : > { %v1671_v59 = vpop.f32.mrb[18].mxu1 }
 0xe19   : > { %v1672_v60 = vadd.f32 %v1671_v59, %v1598_v8  ;;  %v1673_v61 = vpop.f32.mrb[19].mxu1 }
 0xe1a   : > { %v1674_v62 = vadd.f32 %v1673_v61, %v1602_v58 }
 0xe1b   : > { %v1676_v63 = vmax.f32 %v1672_v60, 0.0 }
 0xe1c   : > { %v1677_v1 = vmax.f32 %v1674_v62, 0.0 }
 0xe1e   : > { %1781 = vmatprep.mubr.f32.mxu0 %v1677_v1 }
 0xe1f   : > { %1782 = vmatmul.mubr.f32.vlgmr.msra.gmra.mrb[4].mxu0 %v1676_v63 }
 0xef2   : > { %v2116_v2 = vpop.f32.mrb[4].mxu0 }
 0xef3   : > { %v2117_v3 = vpop.f32.mrb[5].mxu0 }
 0xef4   : > { %v2118_v14 = vadd.f32 %v2117_v3, %v2116_v2 }
 0xef6   : > { %v1784_v17 = vadd.f32 %v2118_v14, %v2023_v15 }
 0xef8   : > { %1789 = vadd.xlane.f32.xlu1 %v1784_v17 }
 0xf85   : > { %v1790_v4 = vpop.xlane.xlu1 %1789 }
 0xf86   : > { %v1791_v5 = vmul.f32 0.0078125, %v1790_v4 }
 0xf88   : > { %v1792_v6 = vsub.f32 %v1784_v17, %v1791_v5 }
 0xf8a   : > { %v1793_v7 = vmul.f32 %v1792_v6, %v1792_v6 }
 0xf8c   : > { %1794 = vadd.xlane.f32.xlu1 %v1793_v7 }
 0xf8d   : > { %2654 = shalt.err (!%p2651_p12)
}
 0xf8e   : > { %s2655_s11 = scalar_lea.hbm %s3238_s22, 512  ;;  %s2659_s25 = scalar_lea.hbm %s3372_s20, 1024 }
 0xf8f   : > { %p2656_p13 = scmp.ne.s32.totalorder %s3238_s22, %s2655_s11  ;;  %p2660_p9 = scmp.lt.u32.totalorder %s3238_s22, %s3372_s20 }
 0xf90   : > { %p2661_p4 = scmp.lt.u32.totalorder %s2659_s25, %s2655_s11  ;;  %p2663_p6 = scmp.lt.u32.totalorder %s2655_s11, %s3238_s22 }
 0xf91   : > { %p2657_p3 = pnand %p2656_p13, %p3373_p0 }
 0xf92   : > { %p2662_p8 = por %p2661_p4, %p2660_p9 }
 0xf93   : > { %p2658_p7 = pneg %p2657_p3 }
 0xf94   : > { %p2664_p2 = por %p2663_p6, %p2662_p8 }
 0xf96   : > { %p2665_p5 = pnand %p2664_p2, %p2658_p7 }
 0xf98   : > { %2668 = shalt.err (!%p2665_p5)
}
 0xf99   : > { %s2767_s21 = smov 128   ;;  %s2768_s14 = smov 8  }
 0xf9a   : > { %2392 = dma.vmem_to_hbm [thread:$0]  (%p3373_p0), %s3240_s13, 512, %s3238_s22, %s1822_s8, %s2767_s21, %s2767_s21, %s2768_s14  }
 0xf9b   : > { %s3374_s28 = sld [smem:[#allocation24_spill]]  ;;  %s3375_s10 = sld [smem:[#allocation25_spill]] }
 0xf9c   : > { %s2028_s18 = sshll.u32 %s2866_s19, 7  ;;  %s3376_s0 = sshll.u32 %s3057_s1, 3 }
 0xf9d   : > { %s544_s13 = scalar_lea.vmem [#allocation11], %s3376_s0  ;;  %s3377_s14 = sld [smem:[#allocation26_spill]] }
 0xf9e   : > { %s1835_s22 = sshll.u32 %s544_s13, 4  ;;  %s1817_s11 = scalar_lea.sflag [#allocation4], %s3057_s1  ;;  %s3281_s22 = int_to_ptr.vmem [resolvable:$true] %s1835_s22 }
 0xf9f   : > { %s2669_s24 = scalar_lea.vmem %s3281_s22, 128  ;;  %s2769_s0 = smov [#allocation11]  }
 0xfa0   : > { %p2670_p10 = scmp.ne.s32.totalorder %s3281_s22, %s2669_s24  ;;  %s2673_s19 = sshll.u32 %s2769_s0, 4  ;;  %s2674_s19 = int_to_ptr.vmem [resolvable:$false] %s2673_s19 }
 0xfa1   : > { %v2024_v12 = vld [vmem:[%s3374_s28] ss:$0 sm:$0xff]  ;;  %s2675_s28 = scalar_lea.vmem %s2674_s19, 256  ;;  %p2676_p12 = scmp.lt.s32.totalorder %s3281_s22, %s2674_s19 }
 0xfa2   : > { %v2025_v16 = vld [vmem:[%s3375_s10] ss:$0 sm:$0xff]  ;;  %p2671_p1 = pnand %p2670_p10, %p3373_p0  ;;  %p2677_p13 = scmp.lt.s32.totalorder %s2675_s28, %s2669_s24 }
 0xfa3   : > { %s3279_s2 = scalar_lea.hbm %s3377_s14, %s2028_s18 }
 0xfa4   : > { %p2672_p11 = pneg %p2671_p1  ;;  %p2678_p3 = por %p2677_p13, %p2676_p12 }
 0xfa6   : > { %p2679_p7 = pnand %p2678_p3, %p2672_p11 }
0x1019   : > { %v1795_v9 = vpop.xlane.xlu1 %1794 }
0x101a   : > { %v1796_v10 = vmul.f32 0.0078125, %v1795_v9 }
0x101c   : > { %v1797_v11 = vadd.f32 1e-05, %v1796_v10 }
0x101e   : > { %2497 = vrsqrt.f32 %v1797_v11 }
0x1028   : > { %v2498_v43 = vpop.eup %2497 }
0x1029   : > { %v1799_v13 = vmul.f32 %v2498_v43, %v1792_v6 }
0x102b   : > { %v1806_v18 = vmul.f32 %v2024_v12, %v1799_v13 }
0x102d   : > { %v1813_v19 = vadd.f32 %v2025_v16, %v1806_v18 }
0x102f   : > { %v1814_v20 = vadd.f32 %v1813_v19, %v3220_v48 }
0x1031   : > { %1815 = vst [vmem:[%s544_s13] sm:$0xff] %v1814_v20 }
0x1032   : > { %2682 = shalt.err (!%p2679_p7)
}
0x1033   : > { %s2683_s1 = scalar_lea.hbm %s3279_s2, 128  ;;  %s2687_s12 = scalar_lea.hbm %s3377_s14, 256 }
0x1034   : > { %p2684_p9 = scmp.ne.s32.totalorder %s3279_s2, %s2683_s1  ;;  %p2688_p6 = scmp.lt.u32.totalorder %s3279_s2, %s3377_s14 }
0x1035   : > { %p2689_p2 = scmp.lt.u32.totalorder %s2687_s12, %s2683_s1  ;;  %p2691_p10 = scmp.lt.u32.totalorder %s2683_s1, %s3279_s2 }
0x1036   : > { %p2685_p4 = pnand %p2684_p9, %p3373_p0 }
0x1037   : > { %p2690_p5 = por %p2689_p2, %p2688_p6 }
0x1038   : > { %p2686_p8 = pneg %p2685_p4 }
0x1039   : > { %p2692_p1 = por %p2691_p10, %p2690_p5 }
0x103b   : > { %p2693_p11 = pnand %p2692_p1, %p2686_p8 }
0x103d   : > { %2696 = shalt.err (!%p2693_p11)
}
0x103e   : > { %2391 = dma.vmem_to_hbm [thread:$0]  (%p3373_p0), %s3281_s22, 128, %s3279_s2, %s1817_s11  }
0x103f PF: > { %s1863_s8 = sand.u32 1, %s2735_s29   ;;  %p3378_p12 = scmp.ne.s32.totalorder %s3361_s17, 0 }
0x1040   : > { %p3379_p13 = scmp.ge.s32.totalorder %s2747_s16, 2  ;;  %s1864_s21 = scalar_lea.sflag [#allocation4], %s1863_s8 }
0x1042   : > { %p2413_p3 = pnand %p3379_p13, %p3378_p12 }
0x1044   : > { %2726 = dma.done.wait (!%p2413_p3), %s1864_s21, 128  }
0x1045   : > { %2728 = vsyncadd (!%p2413_p3), %s1864_s21, 4294967168  ;;  %s1873_s24 = scalar_lea.sflag [#allocation13], %s1863_s8 }
0x1046   : > { %2730 = dma.done.wait (!%p2413_p3), %s1873_s24, 512  }
0x1047   : > { %2732 = vsyncadd (!%p2413_p3), %s1873_s24, 4294966784  ;;  %p33_p0 = scmp.ge.s32.totalorder %s2981_s23, 4   ;;  %s3380_s29 = smov %s2739_s30 }
0x1048   : > { %s3381_s30 = smov %s2743_s15  ;;  %s3382_s15 = smov %s2992_s27 }
0x1049   : > { %s3383_s16 = smov %s2981_s23  ;;  %35 = sbr.rel (!%p33_p0) target bundleno = 19 (0x13), region = 150 }
0x1050   :  { %1878 = vsyncpa [#allocation3], 1 }
0x1051   :  { %1880 = vsyncpa [#allocation3 + $0x1], 1 }
0x1052   :  { %1881 = vsyncpa [#allocation6], 1 }
0x1053   :  { %1882 = vsyncpa [#allocation9], 1 }
0x1054   :  { %1883 = vsyncpa [#allocation4], 1 }
0x1055   :  { %1885 = vsyncpa [#allocation4 + $0x1], 1 }
0x1056   :  { %1886 = vsyncpa [#allocation13], 1 }
0x1057   :  { %1888 = vsyncpa [#allocation13 + $0x1], 1 }

</bundles_post_ra>
